<compile_context>
chip_gen: v7x
topology: tpu7x:2x2x1
jax: 0.10.0
libtpu: 0.0.40
codegen_flags: <defaults>
</compile_context>

<pallas_src>
import jax
import jax.numpy as jnp
from jax import lax
from jax.experimental import pallas as pl
from jax.experimental.pallas import tpu as pltpu

HEADS = 8          # hconv1 heads
OUT1 = 8           # hconv1 out_channels per head
HID = HEADS * OUT1 # 64 after concat
OUT2 = 8           # hconv2 out_channels (heads=1)
NEG_SLOPE = 0.2    # HypergraphConv leaky_relu default


# --------------------------------------------------------------------------
# layer 1: hypergraph attention convolution, all heads fused in one pass
#   grid = (n_e_tiles,)  -- "arbitrary" reduction over hyperedge tiles
# --------------------------------------------------------------------------
def _layer1_kernel(x_ref, ht_ref, dinv_ref, binv_ref, w1_ref, axT_ref, ae_ref,
                   b1_ref, o_ref, x1b_s, sx_s, acc_s):
    e = pl.program_id(0)
    n_e = pl.num_programs(0)

    @pl.when(e == 0)
    def _init():
        # theta transform for all heads at once: [N, 64] (init-only f32 matmul)
        x1 = jnp.dot(x_ref[...], w1_ref[...], preferred_element_type=jnp.float32)
        x1b_s[...] = x1.astype(jnp.bfloat16)          # bf16 cast once, reused
        # per-node per-head attention scores, already in [H, N] orientation
        sx_s[...] = jnp.einsum("hk,nk->hn", axT_ref[...], x1,
                               preferred_element_type=jnp.float32)
        acc_s[...] = jnp.zeros_like(acc_s)

    ht = ht_ref[...]                                   # [TE, N] bf16 (0/1)
    binv = binv_ref[...]                               # [TE, 1]  (0 on padded rows)
    x1b = x1b_s[...]                                   # [N, 64] bf16
    sx = sx_s[...]                                     # [H, N]  f32
    mask = ht > 0

    # fused hyperedge_attr for ALL heads: E1 = Binv * (H^T @ X1)   -> [TE, 64]
    e1 = binv * jnp.dot(ht, x1b, preferred_element_type=jnp.float32)
    # per-edge per-head attention scores (block-diagonal att_e matrix): [TE, H]
    se = jnp.dot(e1, ae_ref[...], preferred_element_type=jnp.float32)

    for h in range(HEADS):                             # static unroll over heads
        lo = h * OUT1
        a = se[:, h:h + 1] + sx[h:h + 1, :]            # [TE, N]
        a = jnp.where(a > 0, a, NEG_SLOPE * a)         # leaky_relu
        a = jnp.where(mask, a, -1e30)                  # mask non-incident nodes
        m = jnp.max(a, axis=-1, keepdims=True)         # lane-axis max
        p = jnp.exp(a - m)                             # masked -> exactly 0
        denom = jnp.sum(p, axis=-1, keepdims=True)     # >= 1 for real edges
        invd = 1.0 / denom                             # exact reciprocal
        p_b = p.astype(jnp.bfloat16)

        # propagation 1 (nodes -> hyperedges), unnormalized p; fold B and both
        # 1/denom factors into a single per-edge scale on the [TE, OUT1] block.
        oe = jnp.dot(p_b, x1b[:, lo:lo + OUT1],
                     preferred_element_type=jnp.float32)           # [TE, 8]
        oe = (binv * (invd * invd)) * oe

        # propagation 2 (hyperedges -> nodes), accumulated across E tiles;
        # contraction over dim 0 puts the transpose on the MXU side.
        on_h = lax.dot_general(p_b, oe.astype(jnp.bfloat16),
                               (((0,), (0,)), ((), ())),
                               preferred_element_type=jnp.float32)  # [N, 8]
        acc_s[:, lo:lo + OUT1] += on_h

    @pl.when(e == n_e - 1)
    def _finalize():
        on = dinv_ref[...] * acc_s[...] + b1_ref[...]               # [N, 64]
        # ELU (alpha = 1); single dense [N, 64] store
        o_ref[...] = jnp.where(on > 0, on, jnp.exp(jnp.minimum(on, 0.0)) - 1.0)


# --------------------------------------------------------------------------
# layer 2: hypergraph conv without attention + log_softmax
#   grid = (n_e_tiles,)  -- "arbitrary" reduction over hyperedge tiles
# --------------------------------------------------------------------------
def _layer2_kernel(y_ref, ht_ref, dinv_ref, binv_ref, w2_ref, b2_ref, o_ref,
                   x2b_s, acc_s):
    e = pl.program_id(0)
    n_e = pl.num_programs(0)

    @pl.when(e == 0)
    def _init():
        # X2 = [N, 64] @ [64, OUT2] -- single K=64 matmul
        x2 = jnp.dot(y_ref[...], w2_ref[...], preferred_element_type=jnp.float32)
        x2b_s[...] = x2.astype(jnp.bfloat16)
        acc_s[...] = jnp.zeros_like(acc_s)

    ht = ht_ref[...]                                    # [TE, N] bf16
    binv = binv_ref[...]                                # [TE, 1]
    oe2 = binv * jnp.dot(ht, x2b_s[...], preferred_element_type=jnp.float32)
    acc_s[...] += lax.dot_general(ht, oe2.astype(jnp.bfloat16),
                                  (((0,), (0,)), ((), ())),
                                  preferred_element_type=jnp.float32)  # [N, OUT2]

    @pl.when(e == n_e - 1)
    def _finalize():
        on2 = dinv_ref[...] * acc_s[...] + b2_ref[...]              # [N, OUT2]
        # log_softmax over classes (dim=1), exact in f32
        m = jnp.max(on2, axis=1, keepdims=True)
        z = on2 - m
        lse = jnp.log(jnp.sum(jnp.exp(z), axis=1, keepdims=True))
        o_ref[...] = z - lse


def _round_up(v, m):
    return ((v + m - 1) // m) * m


def _choose_tile_e(E, N):
    # Streamed working set per grid step (per hyperedge row):
    #   bf16 ht tile, double-buffered: 2 * 2 * N bytes
    #   f32 temporaries (a, p, mask):  ~3 * 4 * N bytes
    #   e1/se/oe/binv rows:            ~2 * 4 * 64 bytes
    per_row = N * (2 * 2 + 3 * 4) + 2 * 4 * HID
    budget = 12 * 1024 * 1024        # conservative: fits every generation
    te = max(16, budget // max(per_row, 1))
    te = min(te, 1024)
    te = (te // 16) * 16             # bf16-safe sublane multiple
    te = min(te, _round_up(E, 16))   # don't over-pad tiny graphs
    return max(te, 16)


def hypergraph_forward(x, h_inc, params, *, tile_e=None):
    """x: [N, Fin] float32, h_inc: [N, E] float32 0/1 incidence matrix."""
    N, Fin = x.shape
    E = h_inc.shape[1]
    if tile_e is None:
        tile_e = _choose_tile_e(E, N)
    tile_e = _round_up(tile_e, 16)
    tile_e = min(tile_e, _round_up(E, 16))
    E_pad = _round_up(E, tile_e)
    n_e = E_pad // tile_e

    # ---- wrapper glue, computed once (exact reciprocals, bf16 incidence) ----
    deg_n = jnp.sum(h_inc, axis=1, keepdims=True)                   # [N, 1]
    deg_e = jnp.sum(h_inc, axis=0)[:, None]                         # [E, 1]
    dinv = jnp.where(deg_n > 0, 1.0 / jnp.maximum(deg_n, 1.0), 0.0)
    binv = jnp.where(deg_e > 0, 1.0 / jnp.maximum(deg_e, 1.0), 0.0)
    ht = h_inc.T.astype(jnp.bfloat16)                               # [E, N]
    if E_pad != E:
        # padded hyperedges: ht row = 0 and binv = 0  => zero contribution
        ht = jnp.pad(ht, ((0, E_pad - E), (0, 0)))
        binv = jnp.pad(binv, ((0, E_pad - E), (0, 0)))

    # ---- parameter layout ----
    w1 = params["w1"]                                               # [Fin, 64]
    att = params["att"]                                             # [H, 2*OUT1]
    ax, ae = att[:, :OUT1], att[:, OUT1:]
    eye = jnp.eye(HEADS, dtype=jnp.float32)
    # block-diagonal attention matrices so per-head scores come from one matmul
    axT = (eye[:, :, None] * ax[:, None, :]).reshape(HEADS, HID)       # [H, 64]
    ae_mat = (eye[:, :, None] * ae[:, None, :]).reshape(HEADS, HID).T  # [64, H]
    b1 = params["b1"].reshape(1, HID)
    w2 = params["w2"]                                               # [64, OUT2]
    b2 = params["b2"].reshape(1, OUT2)

    cparams = pltpu.CompilerParams(dimension_semantics=("arbitrary",),
                                   vmem_limit_bytes=48 * 1024 * 1024)

    # ---------------- layer 1 (attention, all heads fused) ----------------
    out1 = pl.pallas_call(
        _layer1_kernel,
        out_shape=jax.ShapeDtypeStruct((N, HID), jnp.float32),
        grid=(n_e,),
        in_specs=[
            pl.BlockSpec((N, Fin), lambda e: (0, 0)),               # x
            pl.BlockSpec((tile_e, N), lambda e: (e, 0)),            # H^T tile (bf16)
            pl.BlockSpec((N, 1), lambda e: (0, 0)),                 # dinv
            pl.BlockSpec((tile_e, 1), lambda e: (e, 0)),            # binv tile
            pl.BlockSpec((Fin, HID), lambda e: (0, 0)),             # W1 (all heads)
            pl.BlockSpec((HEADS, HID), lambda e: (0, 0)),           # att_x (blockdiag^T)
            pl.BlockSpec((HID, HEADS), lambda e: (0, 0)),           # att_e (blockdiag)
            pl.BlockSpec((1, HID), lambda e: (0, 0)),               # b1
        ],
        out_specs=pl.BlockSpec((N, HID), lambda e: (0, 0)),         # lane-dense [N,64]
        scratch_shapes=[
            pltpu.VMEM((N, HID), jnp.bfloat16),   # X1 (bf16, cast once)
            pltpu.VMEM((HEADS, N), jnp.float32),  # per-node per-head scores
            pltpu.VMEM((N, HID), jnp.float32),    # node-side accumulator
        ],
        compiler_params=cparams,
    )(x, ht, dinv, binv, w1, axT, ae_mat, b1)

    # ---------------- layer 2 + log_softmax ----------------
    out = pl.pallas_call(
        _layer2_kernel,
        out_shape=jax.ShapeDtypeStruct((N, OUT2), jnp.float32),
        grid=(n_e,),
        in_specs=[
            pl.BlockSpec((N, HID), lambda e: (0, 0)),               # out1 [N,64]
            pl.BlockSpec((tile_e, N), lambda e: (e, 0)),            # H^T tile (bf16)
            pl.BlockSpec((N, 1), lambda e: (0, 0)),                 # dinv
            pl.BlockSpec((tile_e, 1), lambda e: (e, 0)),            # binv tile
            pl.BlockSpec((HID, OUT2), lambda e: (0, 0)),            # W2 [64,8]
            pl.BlockSpec((1, OUT2), lambda e: (0, 0)),              # b2
        ],
        out_specs=pl.BlockSpec((N, OUT2), lambda e: (0, 0)),
        scratch_shapes=[
            pltpu.VMEM((N, OUT2), jnp.bfloat16),  # X2 (bf16, cast once)
            pltpu.VMEM((N, OUT2), jnp.float32),   # node-side accumulator
        ],
        compiler_params=cparams,
    )(out1, ht, dinv, binv, w2, b2)

    return out


def init_params(key, num_features):
    k1, k2, k3 = jax.random.split(key, 3)

    def glorot(k, shape):
        fan_in, fan_out = shape[0], shape[-1]
        lim = jnp.sqrt(6.0 / (fan_in + fan_out))
        return jax.random.uniform(k, shape, jnp.float32, -lim, lim)

    return {
        "w1": glorot(k1, (num_features, HID)),        # hconv1 lin (no bias)
        "att": glorot(k2, (HEADS, 2 * OUT1)),         # attention vector
        "b1": jnp.zeros((1, HID), jnp.float32),       # hconv1 bias
        "w2": glorot(k3, (HID, OUT2)),                # hconv2 lin (no bias)
        "b2": jnp.zeros((1, OUT2), jnp.float32),      # hconv2 bias
    }


if __name__ == "__main__":
    key = jax.random.PRNGKey(0)
    kx, kh, kp = jax.random.split(key, 3)

    N, Fin, E = 32, 16, 32
    x = jax.random.normal(kx, (N, Fin), jnp.float32)

    # Deterministic random incidence matrix; every node and hyperedge gets
    # degree >= 1.
    h_inc = jax.random.bernoulli(kh, 0.3, (N, E)).astype(jnp.float32)
    h_inc = h_inc.at[jnp.arange(N), jnp.arange(N) % E].set(1.0)
    h_inc = h_inc.at[jnp.arange(E) % N, jnp.arange(E)].set(1.0)

    params = init_params(kp, Fin)

    # tile_e=16 -> 2 hyperedge tiles: exercises the cross-tile accumulation path.
    out = hypergraph_forward(x, h_inc, params, tile_e=16)
    out = jax.block_until_ready(out)

    assert out.shape == (N, OUT2)
    assert bool(jnp.all(jnp.isfinite(out)))
    # rows of log_softmax should sum (in probability space) to 1
    assert bool(jnp.allclose(jnp.sum(jnp.exp(out), axis=1), 1.0, atol=1e-4))
    print("KERNEL_OK")
</pallas_src>

<mosaic_0001>
module attributes {stable_mosaic.version = 11 : i64} {
  func.func @_layer1_kernel(%arg0: i32, %arg1: memref<32x16xf32, #tpu.memory_space<vmem>>, %arg2: memref<16x32xbf16, #tpu.memory_space<vmem>>, %arg3: memref<32x1xf32, #tpu.memory_space<vmem>>, %arg4: memref<16x1xf32, #tpu.memory_space<vmem>>, %arg5: memref<16x64xf32, #tpu.memory_space<vmem>>, %arg6: memref<8x64xf32, #tpu.memory_space<vmem>>, %arg7: memref<64x8xf32, #tpu.memory_space<vmem>>, %arg8: memref<1x64xf32, #tpu.memory_space<vmem>>, %arg9: memref<32x64xf32, #tpu.memory_space<vmem>>, %arg10: memref<32x64xbf16, #tpu.memory_space<vmem>>, %arg11: memref<8x32xf32, #tpu.memory_space<vmem>>, %arg12: memref<32x64xf32, #tpu.memory_space<vmem>>) attributes {dimension_semantics = [#tpu.dimension_semantics<arbitrary>], iteration_bounds = array<i64: 2>, scalar_prefetch = 0 : i64, scratch_operands = 3 : i64, tpu.core_type = #tpu.core_type<tc>, window_params = [{pipeline_mode = #tpu.pipeline_mode<synchronous>, transform_indices = @transform_0, window_bounds = array<i64: 32, 16>}, {transform_indices = @transform_1, window_bounds = array<i64: 16, 32>}, {pipeline_mode = #tpu.pipeline_mode<synchronous>, transform_indices = @transform_2, window_bounds = array<i64: 32, 1>}, {transform_indices = @transform_3, window_bounds = array<i64: 16, 1>}, {pipeline_mode = #tpu.pipeline_mode<synchronous>, transform_indices = @transform_4, window_bounds = array<i64: 16, 64>}, {pipeline_mode = #tpu.pipeline_mode<synchronous>, transform_indices = @transform_5, window_bounds = array<i64: 8, 64>}, {pipeline_mode = #tpu.pipeline_mode<synchronous>, transform_indices = @transform_6, window_bounds = array<i64: 64, 8>}, {pipeline_mode = #tpu.pipeline_mode<synchronous>, transform_indices = @transform_7, window_bounds = array<i64: 1, 64>}, {pipeline_mode = #tpu.pipeline_mode<synchronous>, transform_indices = @transform_8, window_bounds = array<i64: 32, 64>}]} {
    %c0_i32 = arith.constant 0 : i32
    %0 = arith.cmpi eq, %arg0, %c0_i32 : i32
    %1 = arith.extui %0 : i1 to i32
    %c0_i32_0 = arith.constant 0 : i32
    %2 = arith.cmpi ne, %1, %c0_i32_0 : i32
    scf.if %2 {
      %c0_102 = arith.constant 0 : index
      %c0_103 = arith.constant 0 : index
      %281 = vector.load %arg1[%c0_102, %c0_103] : memref<32x16xf32, #tpu.memory_space<vmem>>, vector<32x16xf32>
      %c0_104 = arith.constant 0 : index
      %c0_105 = arith.constant 0 : index
      %282 = vector.load %arg5[%c0_104, %c0_105] : memref<16x64xf32, #tpu.memory_space<vmem>>, vector<16x64xf32>
      %cst_106 = arith.constant dense<0.000000e+00> : vector<32x64xf32>
      %283 = tpu.matmul %281, %282, %cst_106 {dimension_numbers = #tpu.dot_dimension_numbers<[1], [0], [0], [1], [0, 0, 1, 1], [], []>} : vector<32x16xf32>, vector<16x64xf32>, vector<32x64xf32> -> vector<32x64xf32>
      %284 = arith.truncf %283 : vector<32x64xf32> to vector<32x64xbf16>
      %c0_107 = arith.constant 0 : index
      %c0_108 = arith.constant 0 : index
      %285 = vector.load %arg10[%c0_107, %c0_108] : memref<32x64xbf16, #tpu.memory_space<vmem>>, vector<32x64xbf16>
      tpu.vector_store %arg10[%c0_107, %c0_108], %284 {strides = array<i32>} : memref<32x64xbf16, #tpu.memory_space<vmem>>, vector<32x64xbf16>,
      %c0_109 = arith.constant 0 : index
      %c0_110 = arith.constant 0 : index
      %286 = vector.load %arg6[%c0_109, %c0_110] : memref<8x64xf32, #tpu.memory_space<vmem>>, vector<8x64xf32>
      "tpu.trace_start"() <{level = 10 : i32, message = "hk,nk->hn"}> : () -> ()
      %cst_111 = arith.constant dense<0.000000e+00> : vector<8x32xf32>
      %287 = tpu.matmul %286, %283, %cst_111 {dimension_numbers = #tpu.dot_dimension_numbers<[1], [1], [0], [0], [0, 0, 1, 0], [], []>} : vector<8x64xf32>, vector<32x64xf32>, vector<8x32xf32> -> vector<8x32xf32>
      "tpu.trace_stop"() : () -> ()
      %c0_112 = arith.constant 0 : index
      %c0_113 = arith.constant 0 : index
      %288 = vector.load %arg11[%c0_112, %c0_113] : memref<8x32xf32, #tpu.memory_space<vmem>>, vector<8x32xf32>
      tpu.vector_store %arg11[%c0_112, %c0_113], %287 {strides = array<i32>} : memref<8x32xf32, #tpu.memory_space<vmem>>, vector<8x32xf32>,
      %cst_114 = arith.constant 0.000000e+00 : f32
      %289 = vector.broadcast %cst_114 : f32 to vector<32x64xf32>
      %c0_115 = arith.constant 0 : index
      %c0_116 = arith.constant 0 : index
      %290 = vector.load %arg12[%c0_115, %c0_116] : memref<32x64xf32, #tpu.memory_space<vmem>>, vector<32x64xf32>
      tpu.vector_store %arg12[%c0_115, %c0_116], %289 {strides = array<i32>} : memref<32x64xf32, #tpu.memory_space<vmem>>, vector<32x64xf32>,
    } else {
    }
    %c0 = arith.constant 0 : index
    %c0_1 = arith.constant 0 : index
    %3 = vector.load %arg2[%c0, %c0_1] : memref<16x32xbf16, #tpu.memory_space<vmem>>, vector<16x32xbf16>
    %c0_2 = arith.constant 0 : index
    %c0_3 = arith.constant 0 : index
    %4 = vector.load %arg4[%c0_2, %c0_3] : memref<16x1xf32, #tpu.memory_space<vmem>>, vector<16x1xf32>
    %c0_4 = arith.constant 0 : index
    %c0_5 = arith.constant 0 : index
    %5 = vector.load %arg10[%c0_4, %c0_5] : memref<32x64xbf16, #tpu.memory_space<vmem>>, vector<32x64xbf16>
    %c0_6 = arith.constant 0 : index
    %c0_7 = arith.constant 0 : index
    %6 = vector.load %arg11[%c0_6, %c0_7] : memref<8x32xf32, #tpu.memory_space<vmem>>, vector<8x32xf32>
    %cst = arith.constant 0.000000e+00 : bf16
    %7 = vector.broadcast %cst : bf16 to vector<16x32xbf16>
    %8 = arith.cmpf ogt, %3, %7 : vector<16x32xbf16>
    %cst_8 = arith.constant dense<0.000000e+00> : vector<16x64xf32>
    %9 = tpu.matmul %3, %5, %cst_8 {dimension_numbers = #tpu.dot_dimension_numbers<[1], [0], [0], [1], [0, 0, 1, 1], [], []>} : vector<16x32xbf16>, vector<32x64xbf16>, vector<16x64xf32> -> vector<16x64xf32>
    %10 = vector.broadcast %4 : vector<16x1xf32> to vector<16x64xf32>
    %11 = arith.mulf %10, %9 : vector<16x64xf32>
    %c0_9 = arith.constant 0 : index
    %c0_10 = arith.constant 0 : index
    %12 = vector.load %arg7[%c0_9, %c0_10] : memref<64x8xf32, #tpu.memory_space<vmem>>, vector<64x8xf32>
    %cst_11 = arith.constant dense<0.000000e+00> : vector<16x8xf32>
    %13 = tpu.matmul %11, %12, %cst_11 {dimension_numbers = #tpu.dot_dimension_numbers<[1], [0], [0], [1], [0, 0, 1, 1], [], []>} : vector<16x64xf32>, vector<64x8xf32>, vector<16x8xf32> -> vector<16x8xf32>
    %14 = vector.extract_strided_slice %13 {offsets = [0, 0], sizes = [16, 1], strides = [1, 1]} : vector<16x8xf32> to vector<16x1xf32>
    %15 = vector.extract_strided_slice %6 {offsets = [0, 0], sizes = [1, 32], strides = [1, 1]} : vector<8x32xf32> to vector<1x32xf32>
    %16 = vector.broadcast %14 : vector<16x1xf32> to vector<16x32xf32>
    %17 = vector.broadcast %15 : vector<1x32xf32> to vector<16x32xf32>
    %18 = arith.addf %16, %17 : vector<16x32xf32>
    %cst_12 = arith.constant 0.000000e+00 : f32
    %19 = vector.broadcast %cst_12 : f32 to vector<16x32xf32>
    %20 = arith.cmpf ogt, %18, %19 : vector<16x32xf32>
    %cst_13 = arith.constant 2.000000e-01 : f32
    %21 = vector.broadcast %cst_13 : f32 to vector<16x32xf32>
    %22 = arith.mulf %21, %18 : vector<16x32xf32>
    %23 = arith.select %20, %18, %22 : vector<16x32xi1>, vector<16x32xf32>
    %cst_14 = arith.constant -1.000000e+30 : f32
    %24 = vector.broadcast %cst_14 : f32 to vector<16x32xf32>
    %25 = arith.select %8, %23, %24 : vector<16x32xi1>, vector<16x32xf32>
    %cst_15 = arith.constant dense<0xFF800000> : vector<16xf32>
    %26 = vector.multi_reduction <maximumf>, %25, %cst_15 [1] : vector<16x32xf32> to vector<16xf32>
    %27 = vector.shape_cast %26 : vector<16xf32> to vector<16x1xf32>
    %28 = vector.broadcast %27 : vector<16x1xf32> to vector<16x32xf32>
    %29 = arith.subf %25, %28 : vector<16x32xf32>
    %30 = math.exp %29 : vector<16x32xf32>
    %cst_16 = arith.constant dense<0.000000e+00> : vector<16xf32>
    %31 = vector.multi_reduction <add>, %30, %cst_16 [1] : vector<16x32xf32> to vector<16xf32>
    %32 = vector.shape_cast %31 : vector<16xf32> to vector<16x1xf32>
    %cst_17 = arith.constant 1.000000e+00 : f32
    %33 = vector.broadcast %cst_17 : f32 to vector<16x1xf32>
    %34 = arith.divf %33, %32 : vector<16x1xf32>
    %35 = arith.truncf %30 : vector<16x32xf32> to vector<16x32xbf16>
    %36 = vector.extract_strided_slice %5 {offsets = [0, 0], sizes = [32, 8], strides = [1, 1]} : vector<32x64xbf16> to vector<32x8xbf16>
    %cst_18 = arith.constant dense<0.000000e+00> : vector<16x8xf32>
    %37 = tpu.matmul %35, %36, %cst_18 {dimension_numbers = #tpu.dot_dimension_numbers<[1], [0], [0], [1], [0, 0, 1, 1], [], []>} : vector<16x32xbf16>, vector<32x8xbf16>, vector<16x8xf32> -> vector<16x8xf32>
    %38 = arith.mulf %34, %34 : vector<16x1xf32>
    %39 = arith.mulf %4, %38 : vector<16x1xf32>
    %40 = vector.broadcast %39 : vector<16x1xf32> to vector<16x8xf32>
    %41 = arith.mulf %40, %37 : vector<16x8xf32>
    %42 = arith.truncf %41 : vector<16x8xf32> to vector<16x8xbf16>
    %cst_19 = arith.constant dense<0.000000e+00> : vector<32x8xf32>
    %43 = tpu.matmul %35, %42, %cst_19 {dimension_numbers = #tpu.dot_dimension_numbers<[0], [0], [1], [1], [0, 1, 1, 1], [], []>} : vector<16x32xbf16>, vector<16x8xbf16>, vector<32x8xf32> -> vector<32x8xf32>
    %c0_20 = arith.constant 0 : index
    %c0_21 = arith.constant 0 : index
    %44 = vector.load %arg12[%c0_20, %c0_21] : memref<32x64xf32, #tpu.memory_space<vmem>>, vector<32x8xf32>
    %45 = arith.addf %44, %43 : vector<32x8xf32>
    %c0_22 = arith.constant 0 : index
    %c0_23 = arith.constant 0 : index
    %46 = vector.load %arg12[%c0_22, %c0_23] : memref<32x64xf32, #tpu.memory_space<vmem>>, vector<32x8xf32>
    tpu.vector_store %arg12[%c0_22, %c0_23], %45 {strides = array<i32>} : memref<32x64xf32, #tpu.memory_space<vmem>>, vector<32x8xf32>,
    %47 = vector.extract_strided_slice %13 {offsets = [0, 1], sizes = [16, 1], strides = [1, 1]} : vector<16x8xf32> to vector<16x1xf32>
    %48 = vector.extract_strided_slice %6 {offsets = [1, 0], sizes = [1, 32], strides = [1, 1]} : vector<8x32xf32> to vector<1x32xf32>
    %49 = vector.broadcast %47 : vector<16x1xf32> to vector<16x32xf32>
    %50 = vector.broadcast %48 : vector<1x32xf32> to vector<16x32xf32>
    %51 = arith.addf %49, %50 : vector<16x32xf32>
    %cst_24 = arith.constant 0.000000e+00 : f32
    %52 = vector.broadcast %cst_24 : f32 to vector<16x32xf32>
    %53 = arith.cmpf ogt, %51, %52 : vector<16x32xf32>
    %cst_25 = arith.constant 2.000000e-01 : f32
    %54 = vector.broadcast %cst_25 : f32 to vector<16x32xf32>
    %55 = arith.mulf %54, %51 : vector<16x32xf32>
    %56 = arith.select %53, %51, %55 : vector<16x32xi1>, vector<16x32xf32>
    %cst_26 = arith.constant -1.000000e+30 : f32
    %57 = vector.broadcast %cst_26 : f32 to vector<16x32xf32>
    %58 = arith.select %8, %56, %57 : vector<16x32xi1>, vector<16x32xf32>
    %cst_27 = arith.constant dense<0xFF800000> : vector<16xf32>
    %59 = vector.multi_reduction <maximumf>, %58, %cst_27 [1] : vector<16x32xf32> to vector<16xf32>
    %60 = vector.shape_cast %59 : vector<16xf32> to vector<16x1xf32>
    %61 = vector.broadcast %60 : vector<16x1xf32> to vector<16x32xf32>
    %62 = arith.subf %58, %61 : vector<16x32xf32>
    %63 = math.exp %62 : vector<16x32xf32>
    %cst_28 = arith.constant dense<0.000000e+00> : vector<16xf32>
    %64 = vector.multi_reduction <add>, %63, %cst_28 [1] : vector<16x32xf32> to vector<16xf32>
    %65 = vector.shape_cast %64 : vector<16xf32> to vector<16x1xf32>
    %cst_29 = arith.constant 1.000000e+00 : f32
    %66 = vector.broadcast %cst_29 : f32 to vector<16x1xf32>
    %67 = arith.divf %66, %65 : vector<16x1xf32>
    %68 = arith.truncf %63 : vector<16x32xf32> to vector<16x32xbf16>
    %69 = vector.extract_strided_slice %5 {offsets = [0, 8], sizes = [32, 8], strides = [1, 1]} : vector<32x64xbf16> to vector<32x8xbf16>
    %cst_30 = arith.constant dense<0.000000e+00> : vector<16x8xf32>
    %70 = tpu.matmul %68, %69, %cst_30 {dimension_numbers = #tpu.dot_dimension_numbers<[1], [0], [0], [1], [0, 0, 1, 1], [], []>} : vector<16x32xbf16>, vector<32x8xbf16>, vector<16x8xf32> -> vector<16x8xf32>
    %71 = arith.mulf %67, %67 : vector<16x1xf32>
    %72 = arith.mulf %4, %71 : vector<16x1xf32>
    %73 = vector.broadcast %72 : vector<16x1xf32> to vector<16x8xf32>
    %74 = arith.mulf %73, %70 : vector<16x8xf32>
    %75 = arith.truncf %74 : vector<16x8xf32> to vector<16x8xbf16>
    %cst_31 = arith.constant dense<0.000000e+00> : vector<32x8xf32>
    %76 = tpu.matmul %68, %75, %cst_31 {dimension_numbers = #tpu.dot_dimension_numbers<[0], [0], [1], [1], [0, 1, 1, 1], [], []>} : vector<16x32xbf16>, vector<16x8xbf16>, vector<32x8xf32> -> vector<32x8xf32>
    %c0_32 = arith.constant 0 : index
    %c8 = arith.constant 8 : index
    %77 = vector.load %arg12[%c0_32, %c8] : memref<32x64xf32, #tpu.memory_space<vmem>>, vector<32x8xf32>
    %78 = arith.addf %77, %76 : vector<32x8xf32>
    %c0_33 = arith.constant 0 : index
    %c8_34 = arith.constant 8 : index
    %79 = vector.load %arg12[%c0_33, %c8_34] : memref<32x64xf32, #tpu.memory_space<vmem>>, vector<32x8xf32>
    tpu.vector_store %arg12[%c0_33, %c8_34], %78 {strides = array<i32>} : memref<32x64xf32, #tpu.memory_space<vmem>>, vector<32x8xf32>,
    %80 = vector.extract_strided_slice %13 {offsets = [0, 2], sizes = [16, 1], strides = [1, 1]} : vector<16x8xf32> to vector<16x1xf32>
    %81 = vector.extract_strided_slice %6 {offsets = [2, 0], sizes = [1, 32], strides = [1, 1]} : vector<8x32xf32> to vector<1x32xf32>
    %82 = vector.broadcast %80 : vector<16x1xf32> to vector<16x32xf32>
    %83 = vector.broadcast %81 : vector<1x32xf32> to vector<16x32xf32>
    %84 = arith.addf %82, %83 : vector<16x32xf32>
    %cst_35 = arith.constant 0.000000e+00 : f32
    %85 = vector.broadcast %cst_35 : f32 to vector<16x32xf32>
    %86 = arith.cmpf ogt, %84, %85 : vector<16x32xf32>
    %cst_36 = arith.constant 2.000000e-01 : f32
    %87 = vector.broadcast %cst_36 : f32 to vector<16x32xf32>
    %88 = arith.mulf %87, %84 : vector<16x32xf32>
    %89 = arith.select %86, %84, %88 : vector<16x32xi1>, vector<16x32xf32>
    %cst_37 = arith.constant -1.000000e+30 : f32
    %90 = vector.broadcast %cst_37 : f32 to vector<16x32xf32>
    %91 = arith.select %8, %89, %90 : vector<16x32xi1>, vector<16x32xf32>
    %cst_38 = arith.constant dense<0xFF800000> : vector<16xf32>
    %92 = vector.multi_reduction <maximumf>, %91, %cst_38 [1] : vector<16x32xf32> to vector<16xf32>
    %93 = vector.shape_cast %92 : vector<16xf32> to vector<16x1xf32>
    %94 = vector.broadcast %93 : vector<16x1xf32> to vector<16x32xf32>
    %95 = arith.subf %91, %94 : vector<16x32xf32>
    %96 = math.exp %95 : vector<16x32xf32>
    %cst_39 = arith.constant dense<0.000000e+00> : vector<16xf32>
    %97 = vector.multi_reduction <add>, %96, %cst_39 [1] : vector<16x32xf32> to vector<16xf32>
    %98 = vector.shape_cast %97 : vector<16xf32> to vector<16x1xf32>
    %cst_40 = arith.constant 1.000000e+00 : f32
    %99 = vector.broadcast %cst_40 : f32 to vector<16x1xf32>
    %100 = arith.divf %99, %98 : vector<16x1xf32>
    %101 = arith.truncf %96 : vector<16x32xf32> to vector<16x32xbf16>
    %102 = vector.extract_strided_slice %5 {offsets = [0, 16], sizes = [32, 8], strides = [1, 1]} : vector<32x64xbf16> to vector<32x8xbf16>
    %cst_41 = arith.constant dense<0.000000e+00> : vector<16x8xf32>
    %103 = tpu.matmul %101, %102, %cst_41 {dimension_numbers = #tpu.dot_dimension_numbers<[1], [0], [0], [1], [0, 0, 1, 1], [], []>} : vector<16x32xbf16>, vector<32x8xbf16>, vector<16x8xf32> -> vector<16x8xf32>
    %104 = arith.mulf %100, %100 : vector<16x1xf32>
    %105 = arith.mulf %4, %104 : vector<16x1xf32>
    %106 = vector.broadcast %105 : vector<16x1xf32> to vector<16x8xf32>
    %107 = arith.mulf %106, %103 : vector<16x8xf32>
    %108 = arith.truncf %107 : vector<16x8xf32> to vector<16x8xbf16>
    %cst_42 = arith.constant dense<0.000000e+00> : vector<32x8xf32>
    %109 = tpu.matmul %101, %108, %cst_42 {dimension_numbers = #tpu.dot_dimension_numbers<[0], [0], [1], [1], [0, 1, 1, 1], [], []>} : vector<16x32xbf16>, vector<16x8xbf16>, vector<32x8xf32> -> vector<32x8xf32>
    %c0_43 = arith.constant 0 : index
    %c16 = arith.constant 16 : index
    %110 = vector.load %arg12[%c0_43, %c16] : memref<32x64xf32, #tpu.memory_space<vmem>>, vector<32x8xf32>
    %111 = arith.addf %110, %109 : vector<32x8xf32>
    %c0_44 = arith.constant 0 : index
    %c16_45 = arith.constant 16 : index
    %112 = vector.load %arg12[%c0_44, %c16_45] : memref<32x64xf32, #tpu.memory_space<vmem>>, vector<32x8xf32>
    tpu.vector_store %arg12[%c0_44, %c16_45], %111 {strides = array<i32>} : memref<32x64xf32, #tpu.memory_space<vmem>>, vector<32x8xf32>,
    %113 = vector.extract_strided_slice %13 {offsets = [0, 3], sizes = [16, 1], strides = [1, 1]} : vector<16x8xf32> to vector<16x1xf32>
    %114 = vector.extract_strided_slice %6 {offsets = [3, 0], sizes = [1, 32], strides = [1, 1]} : vector<8x32xf32> to vector<1x32xf32>
    %115 = vector.broadcast %113 : vector<16x1xf32> to vector<16x32xf32>
    %116 = vector.broadcast %114 : vector<1x32xf32> to vector<16x32xf32>
    %117 = arith.addf %115, %116 : vector<16x32xf32>
    %cst_46 = arith.constant 0.000000e+00 : f32
    %118 = vector.broadcast %cst_46 : f32 to vector<16x32xf32>
    %119 = arith.cmpf ogt, %117, %118 : vector<16x32xf32>
    %cst_47 = arith.constant 2.000000e-01 : f32
    %120 = vector.broadcast %cst_47 : f32 to vector<16x32xf32>
    %121 = arith.mulf %120, %117 : vector<16x32xf32>
    %122 = arith.select %119, %117, %121 : vector<16x32xi1>, vector<16x32xf32>
    %cst_48 = arith.constant -1.000000e+30 : f32
    %123 = vector.broadcast %cst_48 : f32 to vector<16x32xf32>
    %124 = arith.select %8, %122, %123 : vector<16x32xi1>, vector<16x32xf32>
    %cst_49 = arith.constant dense<0xFF800000> : vector<16xf32>
    %125 = vector.multi_reduction <maximumf>, %124, %cst_49 [1] : vector<16x32xf32> to vector<16xf32>
    %126 = vector.shape_cast %125 : vector<16xf32> to vector<16x1xf32>
    %127 = vector.broadcast %126 : vector<16x1xf32> to vector<16x32xf32>
    %128 = arith.subf %124, %127 : vector<16x32xf32>
    %129 = math.exp %128 : vector<16x32xf32>
    %cst_50 = arith.constant dense<0.000000e+00> : vector<16xf32>
    %130 = vector.multi_reduction <add>, %129, %cst_50 [1] : vector<16x32xf32> to vector<16xf32>
    %131 = vector.shape_cast %130 : vector<16xf32> to vector<16x1xf32>
    %cst_51 = arith.constant 1.000000e+00 : f32
    %132 = vector.broadcast %cst_51 : f32 to vector<16x1xf32>
    %133 = arith.divf %132, %131 : vector<16x1xf32>
    %134 = arith.truncf %129 : vector<16x32xf32> to vector<16x32xbf16>
    %135 = vector.extract_strided_slice %5 {offsets = [0, 24], sizes = [32, 8], strides = [1, 1]} : vector<32x64xbf16> to vector<32x8xbf16>
    %cst_52 = arith.constant dense<0.000000e+00> : vector<16x8xf32>
    %136 = tpu.matmul %134, %135, %cst_52 {dimension_numbers = #tpu.dot_dimension_numbers<[1], [0], [0], [1], [0, 0, 1, 1], [], []>} : vector<16x32xbf16>, vector<32x8xbf16>, vector<16x8xf32> -> vector<16x8xf32>
    %137 = arith.mulf %133, %133 : vector<16x1xf32>
    %138 = arith.mulf %4, %137 : vector<16x1xf32>
    %139 = vector.broadcast %138 : vector<16x1xf32> to vector<16x8xf32>
    %140 = arith.mulf %139, %136 : vector<16x8xf32>
    %141 = arith.truncf %140 : vector<16x8xf32> to vector<16x8xbf16>
    %cst_53 = arith.constant dense<0.000000e+00> : vector<32x8xf32>
    %142 = tpu.matmul %134, %141, %cst_53 {dimension_numbers = #tpu.dot_dimension_numbers<[0], [0], [1], [1], [0, 1, 1, 1], [], []>} : vector<16x32xbf16>, vector<16x8xbf16>, vector<32x8xf32> -> vector<32x8xf32>
    %c0_54 = arith.constant 0 : index
    %c24 = arith.constant 24 : index
    %143 = vector.load %arg12[%c0_54, %c24] : memref<32x64xf32, #tpu.memory_space<vmem>>, vector<32x8xf32>
    %144 = arith.addf %143, %142 : vector<32x8xf32>
    %c0_55 = arith.constant 0 : index
    %c24_56 = arith.constant 24 : index
    %145 = vector.load %arg12[%c0_55, %c24_56] : memref<32x64xf32, #tpu.memory_space<vmem>>, vector<32x8xf32>
    tpu.vector_store %arg12[%c0_55, %c24_56], %144 {strides = array<i32>} : memref<32x64xf32, #tpu.memory_space<vmem>>, vector<32x8xf32>,
    %146 = vector.extract_strided_slice %13 {offsets = [0, 4], sizes = [16, 1], strides = [1, 1]} : vector<16x8xf32> to vector<16x1xf32>
    %147 = vector.extract_strided_slice %6 {offsets = [4, 0], sizes = [1, 32], strides = [1, 1]} : vector<8x32xf32> to vector<1x32xf32>
    %148 = vector.broadcast %146 : vector<16x1xf32> to vector<16x32xf32>
    %149 = vector.broadcast %147 : vector<1x32xf32> to vector<16x32xf32>
    %150 = arith.addf %148, %149 : vector<16x32xf32>
    %cst_57 = arith.constant 0.000000e+00 : f32
    %151 = vector.broadcast %cst_57 : f32 to vector<16x32xf32>
    %152 = arith.cmpf ogt, %150, %151 : vector<16x32xf32>
    %cst_58 = arith.constant 2.000000e-01 : f32
    %153 = vector.broadcast %cst_58 : f32 to vector<16x32xf32>
    %154 = arith.mulf %153, %150 : vector<16x32xf32>
    %155 = arith.select %152, %150, %154 : vector<16x32xi1>, vector<16x32xf32>
    %cst_59 = arith.constant -1.000000e+30 : f32
    %156 = vector.broadcast %cst_59 : f32 to vector<16x32xf32>
    %157 = arith.select %8, %155, %156 : vector<16x32xi1>, vector<16x32xf32>
    %cst_60 = arith.constant dense<0xFF800000> : vector<16xf32>
    %158 = vector.multi_reduction <maximumf>, %157, %cst_60 [1] : vector<16x32xf32> to vector<16xf32>
    %159 = vector.shape_cast %158 : vector<16xf32> to vector<16x1xf32>
    %160 = vector.broadcast %159 : vector<16x1xf32> to vector<16x32xf32>
    %161 = arith.subf %157, %160 : vector<16x32xf32>
    %162 = math.exp %161 : vector<16x32xf32>
    %cst_61 = arith.constant dense<0.000000e+00> : vector<16xf32>
    %163 = vector.multi_reduction <add>, %162, %cst_61 [1] : vector<16x32xf32> to vector<16xf32>
    %164 = vector.shape_cast %163 : vector<16xf32> to vector<16x1xf32>
    %cst_62 = arith.constant 1.000000e+00 : f32
    %165 = vector.broadcast %cst_62 : f32 to vector<16x1xf32>
    %166 = arith.divf %165, %164 : vector<16x1xf32>
    %167 = arith.truncf %162 : vector<16x32xf32> to vector<16x32xbf16>
    %168 = vector.extract_strided_slice %5 {offsets = [0, 32], sizes = [32, 8], strides = [1, 1]} : vector<32x64xbf16> to vector<32x8xbf16>
    %cst_63 = arith.constant dense<0.000000e+00> : vector<16x8xf32>
    %169 = tpu.matmul %167, %168, %cst_63 {dimension_numbers = #tpu.dot_dimension_numbers<[1], [0], [0], [1], [0, 0, 1, 1], [], []>} : vector<16x32xbf16>, vector<32x8xbf16>, vector<16x8xf32> -> vector<16x8xf32>
    %170 = arith.mulf %166, %166 : vector<16x1xf32>
    %171 = arith.mulf %4, %170 : vector<16x1xf32>
    %172 = vector.broadcast %171 : vector<16x1xf32> to vector<16x8xf32>
    %173 = arith.mulf %172, %169 : vector<16x8xf32>
    %174 = arith.truncf %173 : vector<16x8xf32> to vector<16x8xbf16>
    %cst_64 = arith.constant dense<0.000000e+00> : vector<32x8xf32>
    %175 = tpu.matmul %167, %174, %cst_64 {dimension_numbers = #tpu.dot_dimension_numbers<[0], [0], [1], [1], [0, 1, 1, 1], [], []>} : vector<16x32xbf16>, vector<16x8xbf16>, vector<32x8xf32> -> vector<32x8xf32>
    %c0_65 = arith.constant 0 : index
    %c32 = arith.constant 32 : index
    %176 = vector.load %arg12[%c0_65, %c32] : memref<32x64xf32, #tpu.memory_space<vmem>>, vector<32x8xf32>
    %177 = arith.addf %176, %175 : vector<32x8xf32>
    %c0_66 = arith.constant 0 : index
    %c32_67 = arith.constant 32 : index
    %178 = vector.load %arg12[%c0_66, %c32_67] : memref<32x64xf32, #tpu.memory_space<vmem>>, vector<32x8xf32>
    tpu.vector_store %arg12[%c0_66, %c32_67], %177 {strides = array<i32>} : memref<32x64xf32, #tpu.memory_space<vmem>>, vector<32x8xf32>,
    %179 = vector.extract_strided_slice %13 {offsets = [0, 5], sizes = [16, 1], strides = [1, 1]} : vector<16x8xf32> to vector<16x1xf32>
    %180 = vector.extract_strided_slice %6 {offsets = [5, 0], sizes = [1, 32], strides = [1, 1]} : vector<8x32xf32> to vector<1x32xf32>
    %181 = vector.broadcast %179 : vector<16x1xf32> to vector<16x32xf32>
    %182 = vector.broadcast %180 : vector<1x32xf32> to vector<16x32xf32>
    %183 = arith.addf %181, %182 : vector<16x32xf32>
    %cst_68 = arith.constant 0.000000e+00 : f32
    %184 = vector.broadcast %cst_68 : f32 to vector<16x32xf32>
    %185 = arith.cmpf ogt, %183, %184 : vector<16x32xf32>
    %cst_69 = arith.constant 2.000000e-01 : f32
    %186 = vector.broadcast %cst_69 : f32 to vector<16x32xf32>
    %187 = arith.mulf %186, %183 : vector<16x32xf32>
    %188 = arith.select %185, %183, %187 : vector<16x32xi1>, vector<16x32xf32>
    %cst_70 = arith.constant -1.000000e+30 : f32
    %189 = vector.broadcast %cst_70 : f32 to vector<16x32xf32>
    %190 = arith.select %8, %188, %189 : vector<16x32xi1>, vector<16x32xf32>
    %cst_71 = arith.constant dense<0xFF800000> : vector<16xf32>
    %191 = vector.multi_reduction <maximumf>, %190, %cst_71 [1] : vector<16x32xf32> to vector<16xf32>
    %192 = vector.shape_cast %191 : vector<16xf32> to vector<16x1xf32>
    %193 = vector.broadcast %192 : vector<16x1xf32> to vector<16x32xf32>
    %194 = arith.subf %190, %193 : vector<16x32xf32>
    %195 = math.exp %194 : vector<16x32xf32>
    %cst_72 = arith.constant dense<0.000000e+00> : vector<16xf32>
    %196 = vector.multi_reduction <add>, %195, %cst_72 [1] : vector<16x32xf32> to vector<16xf32>
    %197 = vector.shape_cast %196 : vector<16xf32> to vector<16x1xf32>
    %cst_73 = arith.constant 1.000000e+00 : f32
    %198 = vector.broadcast %cst_73 : f32 to vector<16x1xf32>
    %199 = arith.divf %198, %197 : vector<16x1xf32>
    %200 = arith.truncf %195 : vector<16x32xf32> to vector<16x32xbf16>
    %201 = vector.extract_strided_slice %5 {offsets = [0, 40], sizes = [32, 8], strides = [1, 1]} : vector<32x64xbf16> to vector<32x8xbf16>
    %cst_74 = arith.constant dense<0.000000e+00> : vector<16x8xf32>
    %202 = tpu.matmul %200, %201, %cst_74 {dimension_numbers = #tpu.dot_dimension_numbers<[1], [0], [0], [1], [0, 0, 1, 1], [], []>} : vector<16x32xbf16>, vector<32x8xbf16>, vector<16x8xf32> -> vector<16x8xf32>
    %203 = arith.mulf %199, %199 : vector<16x1xf32>
    %204 = arith.mulf %4, %203 : vector<16x1xf32>
    %205 = vector.broadcast %204 : vector<16x1xf32> to vector<16x8xf32>
    %206 = arith.mulf %205, %202 : vector<16x8xf32>
    %207 = arith.truncf %206 : vector<16x8xf32> to vector<16x8xbf16>
    %cst_75 = arith.constant dense<0.000000e+00> : vector<32x8xf32>
    %208 = tpu.matmul %200, %207, %cst_75 {dimension_numbers = #tpu.dot_dimension_numbers<[0], [0], [1], [1], [0, 1, 1, 1], [], []>} : vector<16x32xbf16>, vector<16x8xbf16>, vector<32x8xf32> -> vector<32x8xf32>
    %c0_76 = arith.constant 0 : index
    %c40 = arith.constant 40 : index
    %209 = vector.load %arg12[%c0_76, %c40] : memref<32x64xf32, #tpu.memory_space<vmem>>, vector<32x8xf32>
    %210 = arith.addf %209, %208 : vector<32x8xf32>
    %c0_77 = arith.constant 0 : index
    %c40_78 = arith.constant 40 : index
    %211 = vector.load %arg12[%c0_77, %c40_78] : memref<32x64xf32, #tpu.memory_space<vmem>>, vector<32x8xf32>
    tpu.vector_store %arg12[%c0_77, %c40_78], %210 {strides = array<i32>} : memref<32x64xf32, #tpu.memory_space<vmem>>, vector<32x8xf32>,
    %212 = vector.extract_strided_slice %13 {offsets = [0, 6], sizes = [16, 1], strides = [1, 1]} : vector<16x8xf32> to vector<16x1xf32>
    %213 = vector.extract_strided_slice %6 {offsets = [6, 0], sizes = [1, 32], strides = [1, 1]} : vector<8x32xf32> to vector<1x32xf32>
    %214 = vector.broadcast %212 : vector<16x1xf32> to vector<16x32xf32>
    %215 = vector.broadcast %213 : vector<1x32xf32> to vector<16x32xf32>
    %216 = arith.addf %214, %215 : vector<16x32xf32>
    %cst_79 = arith.constant 0.000000e+00 : f32
    %217 = vector.broadcast %cst_79 : f32 to vector<16x32xf32>
    %218 = arith.cmpf ogt, %216, %217 : vector<16x32xf32>
    %cst_80 = arith.constant 2.000000e-01 : f32
    %219 = vector.broadcast %cst_80 : f32 to vector<16x32xf32>
    %220 = arith.mulf %219, %216 : vector<16x32xf32>
    %221 = arith.select %218, %216, %220 : vector<16x32xi1>, vector<16x32xf32>
    %cst_81 = arith.constant -1.000000e+30 : f32
    %222 = vector.broadcast %cst_81 : f32 to vector<16x32xf32>
    %223 = arith.select %8, %221, %222 : vector<16x32xi1>, vector<16x32xf32>
    %cst_82 = arith.constant dense<0xFF800000> : vector<16xf32>
    %224 = vector.multi_reduction <maximumf>, %223, %cst_82 [1] : vector<16x32xf32> to vector<16xf32>
    %225 = vector.shape_cast %224 : vector<16xf32> to vector<16x1xf32>
    %226 = vector.broadcast %225 : vector<16x1xf32> to vector<16x32xf32>
    %227 = arith.subf %223, %226 : vector<16x32xf32>
    %228 = math.exp %227 : vector<16x32xf32>
    %cst_83 = arith.constant dense<0.000000e+00> : vector<16xf32>
    %229 = vector.multi_reduction <add>, %228, %cst_83 [1] : vector<16x32xf32> to vector<16xf32>
    %230 = vector.shape_cast %229 : vector<16xf32> to vector<16x1xf32>
    %cst_84 = arith.constant 1.000000e+00 : f32
    %231 = vector.broadcast %cst_84 : f32 to vector<16x1xf32>
    %232 = arith.divf %231, %230 : vector<16x1xf32>
    %233 = arith.truncf %228 : vector<16x32xf32> to vector<16x32xbf16>
    %234 = vector.extract_strided_slice %5 {offsets = [0, 48], sizes = [32, 8], strides = [1, 1]} : vector<32x64xbf16> to vector<32x8xbf16>
    %cst_85 = arith.constant dense<0.000000e+00> : vector<16x8xf32>
    %235 = tpu.matmul %233, %234, %cst_85 {dimension_numbers = #tpu.dot_dimension_numbers<[1], [0], [0], [1], [0, 0, 1, 1], [], []>} : vector<16x32xbf16>, vector<32x8xbf16>, vector<16x8xf32> -> vector<16x8xf32>
    %236 = arith.mulf %232, %232 : vector<16x1xf32>
    %237 = arith.mulf %4, %236 : vector<16x1xf32>
    %238 = vector.broadcast %237 : vector<16x1xf32> to vector<16x8xf32>
    %239 = arith.mulf %238, %235 : vector<16x8xf32>
    %240 = arith.truncf %239 : vector<16x8xf32> to vector<16x8xbf16>
    %cst_86 = arith.constant dense<0.000000e+00> : vector<32x8xf32>
    %241 = tpu.matmul %233, %240, %cst_86 {dimension_numbers = #tpu.dot_dimension_numbers<[0], [0], [1], [1], [0, 1, 1, 1], [], []>} : vector<16x32xbf16>, vector<16x8xbf16>, vector<32x8xf32> -> vector<32x8xf32>
    %c0_87 = arith.constant 0 : index
    %c48 = arith.constant 48 : index
    %242 = vector.load %arg12[%c0_87, %c48] : memref<32x64xf32, #tpu.memory_space<vmem>>, vector<32x8xf32>
    %243 = arith.addf %242, %241 : vector<32x8xf32>
    %c0_88 = arith.constant 0 : index
    %c48_89 = arith.constant 48 : index
    %244 = vector.load %arg12[%c0_88, %c48_89] : memref<32x64xf32, #tpu.memory_space<vmem>>, vector<32x8xf32>
    tpu.vector_store %arg12[%c0_88, %c48_89], %243 {strides = array<i32>} : memref<32x64xf32, #tpu.memory_space<vmem>>, vector<32x8xf32>,
    %245 = vector.extract_strided_slice %13 {offsets = [0, 7], sizes = [16, 1], strides = [1, 1]} : vector<16x8xf32> to vector<16x1xf32>
    %246 = vector.extract_strided_slice %6 {offsets = [7, 0], sizes = [1, 32], strides = [1, 1]} : vector<8x32xf32> to vector<1x32xf32>
    %247 = vector.broadcast %245 : vector<16x1xf32> to vector<16x32xf32>
    %248 = vector.broadcast %246 : vector<1x32xf32> to vector<16x32xf32>
    %249 = arith.addf %247, %248 : vector<16x32xf32>
    %cst_90 = arith.constant 0.000000e+00 : f32
    %250 = vector.broadcast %cst_90 : f32 to vector<16x32xf32>
    %251 = arith.cmpf ogt, %249, %250 : vector<16x32xf32>
    %cst_91 = arith.constant 2.000000e-01 : f32
    %252 = vector.broadcast %cst_91 : f32 to vector<16x32xf32>
    %253 = arith.mulf %252, %249 : vector<16x32xf32>
    %254 = arith.select %251, %249, %253 : vector<16x32xi1>, vector<16x32xf32>
    %cst_92 = arith.constant -1.000000e+30 : f32
    %255 = vector.broadcast %cst_92 : f32 to vector<16x32xf32>
    %256 = arith.select %8, %254, %255 : vector<16x32xi1>, vector<16x32xf32>
    %cst_93 = arith.constant dense<0xFF800000> : vector<16xf32>
    %257 = vector.multi_reduction <maximumf>, %256, %cst_93 [1] : vector<16x32xf32> to vector<16xf32>
    %258 = vector.shape_cast %257 : vector<16xf32> to vector<16x1xf32>
    %259 = vector.broadcast %258 : vector<16x1xf32> to vector<16x32xf32>
    %260 = arith.subf %256, %259 : vector<16x32xf32>
    %261 = math.exp %260 : vector<16x32xf32>
    %cst_94 = arith.constant dense<0.000000e+00> : vector<16xf32>
    %262 = vector.multi_reduction <add>, %261, %cst_94 [1] : vector<16x32xf32> to vector<16xf32>
    %263 = vector.shape_cast %262 : vector<16xf32> to vector<16x1xf32>
    %cst_95 = arith.constant 1.000000e+00 : f32
    %264 = vector.broadcast %cst_95 : f32 to vector<16x1xf32>
    %265 = arith.divf %264, %263 : vector<16x1xf32>
    %266 = arith.truncf %261 : vector<16x32xf32> to vector<16x32xbf16>
    %267 = vector.extract_strided_slice %5 {offsets = [0, 56], sizes = [32, 8], strides = [1, 1]} : vector<32x64xbf16> to vector<32x8xbf16>
    %cst_96 = arith.constant dense<0.000000e+00> : vector<16x8xf32>
    %268 = tpu.matmul %266, %267, %cst_96 {dimension_numbers = #tpu.dot_dimension_numbers<[1], [0], [0], [1], [0, 0, 1, 1], [], []>} : vector<16x32xbf16>, vector<32x8xbf16>, vector<16x8xf32> -> vector<16x8xf32>
    %269 = arith.mulf %265, %265 : vector<16x1xf32>
    %270 = arith.mulf %4, %269 : vector<16x1xf32>
    %271 = vector.broadcast %270 : vector<16x1xf32> to vector<16x8xf32>
    %272 = arith.mulf %271, %268 : vector<16x8xf32>
    %273 = arith.truncf %272 : vector<16x8xf32> to vector<16x8xbf16>
    %cst_97 = arith.constant dense<0.000000e+00> : vector<32x8xf32>
    %274 = tpu.matmul %266, %273, %cst_97 {dimension_numbers = #tpu.dot_dimension_numbers<[0], [0], [1], [1], [0, 1, 1, 1], [], []>} : vector<16x32xbf16>, vector<16x8xbf16>, vector<32x8xf32> -> vector<32x8xf32>
    %c0_98 = arith.constant 0 : index
    %c56 = arith.constant 56 : index
    %275 = vector.load %arg12[%c0_98, %c56] : memref<32x64xf32, #tpu.memory_space<vmem>>, vector<32x8xf32>
    %276 = arith.addf %275, %274 : vector<32x8xf32>
    %c0_99 = arith.constant 0 : index
    %c56_100 = arith.constant 56 : index
    %277 = vector.load %arg12[%c0_99, %c56_100] : memref<32x64xf32, #tpu.memory_space<vmem>>, vector<32x8xf32>
    tpu.vector_store %arg12[%c0_99, %c56_100], %276 {strides = array<i32>} : memref<32x64xf32, #tpu.memory_space<vmem>>, vector<32x8xf32>,
    %c1_i32 = arith.constant 1 : i32
    %278 = arith.cmpi eq, %arg0, %c1_i32 : i32
    %279 = arith.extui %278 : i1 to i32
    %c0_i32_101 = arith.constant 0 : i32
    %280 = arith.cmpi ne, %279, %c0_i32_101 : i32
    scf.if %280 {
      %c0_102 = arith.constant 0 : index
      %c0_103 = arith.constant 0 : index
      %281 = vector.load %arg3[%c0_102, %c0_103] : memref<32x1xf32, #tpu.memory_space<vmem>>, vector<32x1xf32>
      %c0_104 = arith.constant 0 : index
      %c0_105 = arith.constant 0 : index
      %282 = vector.load %arg12[%c0_104, %c0_105] : memref<32x64xf32, #tpu.memory_space<vmem>>, vector<32x64xf32>
      %283 = vector.broadcast %281 : vector<32x1xf32> to vector<32x64xf32>
      %284 = arith.mulf %283, %282 : vector<32x64xf32>
      %c0_106 = arith.constant 0 : index
      %c0_107 = arith.constant 0 : index
      %285 = vector.load %arg8[%c0_106, %c0_107] : memref<1x64xf32, #tpu.memory_space<vmem>>, vector<1x64xf32>
      %286 = vector.broadcast %285 : vector<1x64xf32> to vector<32x64xf32>
      %287 = arith.addf %284, %286 : vector<32x64xf32>
      %cst_108 = arith.constant 0.000000e+00 : f32
      %288 = vector.broadcast %cst_108 : f32 to vector<32x64xf32>
      %289 = arith.cmpf ogt, %287, %288 : vector<32x64xf32>
      %cst_109 = arith.constant 0.000000e+00 : f32
      %290 = vector.broadcast %cst_109 : f32 to vector<32x64xf32>
      %291 = arith.minimumf %287, %290 : vector<32x64xf32>
      %292 = math.exp %291 : vector<32x64xf32>
      %cst_110 = arith.constant 1.000000e+00 : f32
      %293 = vector.broadcast %cst_110 : f32 to vector<32x64xf32>
      %294 = arith.subf %292, %293 : vector<32x64xf32>
      %295 = arith.select %289, %287, %294 : vector<32x64xi1>, vector<32x64xf32>
      %c0_111 = arith.constant 0 : index
      %c0_112 = arith.constant 0 : index
      %296 = vector.load %arg9[%c0_111, %c0_112] : memref<32x64xf32, #tpu.memory_space<vmem>>, vector<32x64xf32>
      tpu.vector_store %arg9[%c0_111, %c0_112], %295 {strides = array<i32>} : memref<32x64xf32, #tpu.memory_space<vmem>>, vector<32x64xf32>,
    } else {
    }
    return
  }
  func.func @transform_0(%arg0: i32) -> (i32, i32) {
    %c0_i32 = arith.constant 0 : i32
    %c0_i32_0 = arith.constant 0 : i32
    %c0_i32_1 = arith.constant 0 : i32
    return %c0_i32, %c0_i32_0 : i32, i32
  }
  func.func @transform_1(%arg0: i32) -> (i32, i32) {
    %c0_i32 = arith.constant 0 : i32
    %c0_i32_0 = arith.constant 0 : i32
    return %arg0, %c0_i32 : i32, i32
  }
  func.func @transform_2(%arg0: i32) -> (i32, i32) {
    %c0_i32 = arith.constant 0 : i32
    %c0_i32_0 = arith.constant 0 : i32
    %c0_i32_1 = arith.constant 0 : i32
    return %c0_i32, %c0_i32_0 : i32, i32
  }
  func.func @transform_3(%arg0: i32) -> (i32, i32) {
    %c0_i32 = arith.constant 0 : i32
    %c0_i32_0 = arith.constant 0 : i32
    return %arg0, %c0_i32 : i32, i32
  }
  func.func @transform_4(%arg0: i32) -> (i32, i32) {
    %c0_i32 = arith.constant 0 : i32
    %c0_i32_0 = arith.constant 0 : i32
    %c0_i32_1 = arith.constant 0 : i32
    return %c0_i32, %c0_i32_0 : i32, i32
  }
  func.func @transform_5(%arg0: i32) -> (i32, i32) {
    %c0_i32 = arith.constant 0 : i32
    %c0_i32_0 = arith.constant 0 : i32
    %c0_i32_1 = arith.constant 0 : i32
    return %c0_i32, %c0_i32_0 : i32, i32
  }
  func.func @transform_6(%arg0: i32) -> (i32, i32) {
    %c0_i32 = arith.constant 0 : i32
    %c0_i32_0 = arith.constant 0 : i32
    %c0_i32_1 = arith.constant 0 : i32
    return %c0_i32, %c0_i32_0 : i32, i32
  }
  func.func @transform_7(%arg0: i32) -> (i32, i32) {
    %c0_i32 = arith.constant 0 : i32
    %c0_i32_0 = arith.constant 0 : i32
    %c0_i32_1 = arith.constant 0 : i32
    return %c0_i32, %c0_i32_0 : i32, i32
  }
  func.func @transform_8(%arg0: i32) -> (i32, i32) {
    %c0_i32 = arith.constant 0 : i32
    %c0_i32_0 = arith.constant 0 : i32
    %c0_i32_1 = arith.constant 0 : i32
    return %c0_i32, %c0_i32_0 : i32, i32
  }
}

</mosaic_0001>

<bundles_post_ra>
// kernel: tpu_custom_call.1
= control target key start
LH: loop header
LB: loop body
LE: loop exit
PB: predicated region body
PF: predicated region fallthrough
CT: control target
= control target key end

     0   :  { %13 = vsyncpa [#allocation6], 0  ;;  %s3074_s27 = smov 0   ;;  %s3584_s0 = inlined_call_operand.vmem [shape: f32[32,16], index: 0, kind: input, shape index: {}]   ;;  %s3585_s1 = inlined_call_operand.vmem [shape: bf16[32,32], index: 1, kind: input, shape index: {}]   ;;  %s3586_s2 = inlined_call_operand.vmem [shape: f32[32,1], index: 2, kind: input, shape index: {}]   ;;  %s3587_s3 = inlined_call_operand.vmem [shape: f32[32,1], index: 3, kind: input, shape index: {}]   ;;  %s3588_s4 = inlined_call_operand.vmem [shape: f32[16,64], index: 4, kind: input, shape index: {}]   ;;  %s3589_s5 = inlined_call_operand.vmem [shape: f32[8,64], index: 5, kind: input, shape index: {}]   ;;  %s3590_s6 = inlined_call_operand.vmem [shape: f32[64,8], index: 6, kind: input, shape index: {}]   ;;  %s3591_s7 = inlined_call_operand.vmem [shape: f32[1,64], index: 7, kind: input, shape index: {}]   ;;  %s3592_s8 = inlined_call_operand.hbm [shape: f32[32,64], index: 8, kind: output, shape index: {}]  }
   0x1 LB: > { %s3080_s28 = sadd.s32 4294967295, %s2997_s27   ;;  %p2508_p0 = scmp.ge.s32.totalorder %s2997_s27, 1  ;;  %s2997_s27 = sphi %s3074_s27, %s19_s27  }
   0x2   : > { %p270_p1 = scmp.lt.s32.totalorder %s2997_s27, 3 }
   0x4   : > { %p271_p2 = pnand %p2508_p0, %p270_p1 }
   0x5   : > { %s2509_s29 = sshll.u32 (!%p271_p2), %s3080_s28, 1  ;;  %p2513_p4 = scmp.ne.s32.totalorder (!%p271_p2), %s3080_s28, 0 }
   0x6   : > { %274 = sbr.rel (%p271_p2) target bundleno = 2092 (0x82c), region = 52  ;;  %p305_p3 = scmp.lt.s32.totalorder (!%p271_p2), %s2509_s29, 3 }
   0xd   : > { %s3598_s29 = smov (!%p305_p3, %s2509_s29), 3  ;;  %322 = sbr.rel (%p2513_p4) target bundleno = 464 (0x1d0), region = 56 }
   0xe   : > { %s2510_s30 = sshll.u32 %s3598_s29, 2  ;;  %s2512_s9 = sshll.u32 %s3598_s29, 3  ;;  %v327_v0 = vld [vmem:[%s3588_s4] sm:$0xff] (!%p2513_p4)  ;;  %v328_v1 = vld [vmem:[%s3588_s4 + $0x8] sm:$0xff] (!%p2513_p4)  ;;  %vm329_vm0 = vcmask (!%p2513_p4), 130048   ;;  %v325_v5 = vld [vmem:[%s3584_s0 + $0x10] sm:$0xff] (!%p2513_p4) }
   0xf   : > { %s3088_s12 = scalar_lea.vmem %s3585_s1, %s2510_s30  ;;  %s3093_s15 = scalar_lea.vmem %s3587_s3, %s2512_s9  ;;  %v323_v2 = vld [vmem:[%s3584_s0] sm:$0xff] (!%p2513_p4)  ;;  %v2793_v3 = vpack.c.bf16 (!%p2513_p4), %v328_v1, %v327_v0  ;;  %v324_v4 = vld [vmem:[%s3584_s0 + $0x8] sm:$0xff] (!%p2513_p4)  ;;  %v326_v6 = vld [vmem:[%s3584_s0 + $0x18] sm:$0xff] (!%p2513_p4)  ;;  %v2999_v7 = vmov (!%p2513_p4), 0.0|0.0   ;;  %vm429_vm1 = vcmask (!%p2513_p4), 523264   ;;  %vm3000_vm2 = vmmov (!%p2513_p4), 0  }
  0x10   : > { %2637 = vmatprep.mubr.msk.f32.mxu0 (!%p2513_p4), %vm329_vm0, %v323_v2  ;;  %2797 = vmatprep.subr.bf16.mxu1 (!%p2513_p4), %v2999_v7  ;;  %v3001_v8 = vmov (!%p2513_p4), 0.0   ;;  %vm2799_vm3 = vmpackc.low (!%p2513_p4), %vm429_vm1, %vm429_vm1  ;;  %v432_v15 = vld [vmem:[%s3589_s5] sm:$0xff] (!%p2513_p4)  ;;  %vm518_vm4 = vcmask (!%p2513_p4), 261120  }
  0x11   : > { %2794 = vmatprep.subr.bf16.mxu0 (!%p2513_p4), %v2793_v3  ;;  %2651 = vmatprep.mubr.msk.f32.mxu1 (!%p2513_p4), %vm3000_vm2, %v3001_v8  ;;  %520 = vst.msk [vmem:[#allocation4] sm:$0xff] (!%p2513_p4), %vm429_vm1, %v3001_v8  ;;  %521 = vst.msk [vmem:[#allocation4 + $0x8] sm:$0xff] (!%p2513_p4), %vm429_vm1, %v3001_v8 }
  0x12   : > { %2796 = vmatpush3.bf16.msra.mxu0 (!%p2513_p4), %v2793_v3  ;;  %522 = vst.msk [vmem:[#allocation4 + $0x10] sm:$0xff] (!%p2513_p4), %vm429_vm1, %v3001_v8  ;;  %523 = vst.msk [vmem:[#allocation4 + $0x18] sm:$0xff] (!%p2513_p4), %vm429_vm1, %v3001_v8 }
  0x15   : > { %2638 = vmatmul.mubr.msk.f32.vlgmr.msra.gmra.mrb[0].mxu0 %vm329_vm0, %v324_v4 }
  0x16   : > { %2640 = vmatprep.mubr.msk.f32.mxu0 %vm329_vm0, %v325_v5 }
  0x19   : > { %2641 = vmatmul.mubr.msk.f32.gmra.mrb[2].mxu0 %vm329_vm0, %v326_v6 }
  0xe8   : > { %v2639_v9 = vpop.f32.mrb[0].mxu0 }
  0xe9   : > { %v408_v10 = vpop.f32.mrb[1].mxu0 }
  0xea   : > { %v427_v11 = vpack.c.bf16 %v2639_v9, %v408_v10 }
  0xec   : > { %430 = vst.msk [vmem:[#allocation2] sm:$0xff] %vm429_vm1, %v427_v11  ;;  %2800 = vmatpush3.bf16.xpose.msk.msra.mxu1 %vm2799_vm3, %v427_v11  ;;  %v2642_v12 = vpop.f32.mrb[2].mxu0 }
  0xed   : > { %v418_v13 = vpop.f32.mrb[3].mxu0  ;;  %2801 = vmatprep.subr.bf16.mxu1 %v2999_v7 }
  0xee   : > { %v428_v14 = vpack.c.bf16 %v2642_v12, %v418_v13 }
  0xf0   : > { %431 = vst.msk [vmem:[#allocation2 + $0x8] sm:$0xff] %vm429_vm1, %v428_v14 }
  0xf4   : > { %2804 = vmatpush3.bf16.xpose.msk.msra.mxu1 %vm2799_vm3, %v428_v14 }
  0xfb   : > { %2652 = vmatmul.mubr.msk.f32.vlgmr.msra.gmra.mrb[0].mxu1 %vm429_vm1, %v432_v15 }
 0x1ce   : > { %v514_v16 = vpop.f32.mrb[0].mxu1 }
 0x1cf   : > { %519 = vst.msk [vmem:[#allocation3] sm:$0xff] %vm518_vm4, %v514_v16  ;;  %v2653_v17 = vpop.f32.mrb[1].mxu1 }
 0x1d0 PF: > { %v3126_v18 = vld [vmem:[#allocation2] sm:$0xff]  ;;  %v3002_v19 = vmov 0.0   ;;  %vm3003_vm5 = vmmov 0   ;;  %v3004_v23 = vmov 0   ;;  %v596_v25 = vld [vmem:[%s3590_s6 + $0x8] sm:$0xff]  ;;  %v597_v28 = vld [vmem:[%s3590_s6 + $0x10] sm:$0xff]  ;;  %v695_v58 = vlaneseq }
 0x1d1   : > { %2654 = vmatprep.subr.bf16.mxu0 %v3002_v19  ;;  %2658 = vmatprep.mubr.msk.bf16.mxu0 %vm3003_vm5, %v3002_v19  ;;  %v3132_v20 = vld [vmem:[%s3088_s12] sm:$0xf]  ;;  %v3139_v22 = vld [vmem:[%s3088_s12 + $0x4] sm:$0xf]  ;;  %v3149_v26 = vld [vmem:[#allocation2 + $0x8] sm:$0xff]  ;;  %vm538_vm6 = vcmask 261120  }
 0x1d2   : > { %v3135_v21 = vld [vmem:[%s3093_s15] sm:$0xff]  ;;  %2655 = vmatpush3.bf16.msra.mxu0 %v3126_v18  ;;  %2865 = vset.pattern.permute.xlu0 %v3004_v23  ;;  %v598_v29 = vld [vmem:[%s3590_s6 + $0x18] sm:$0xff]  ;;  %v3159_v30 = vld [vmem:[%s3093_s15 + $0x8] sm:$0xff]  ;;  %v2523_v34 = vcombine.low %v3132_v20, %v3139_v22  ;;  %s3005_s29 = smov 120   ;;  %v3006_v39 = vmov 2   ;;  %s3007_s30 = smov 112  }
 0x1d3   : > { %v595_v24 = vld [vmem:[%s3590_s6] sm:$0xff]  ;;  %2656 = vmatprep.subr.bf16.mxu0 %v3002_v19  ;;  %585 = vperm.xlu0 %2865, %v3135_v21   ;;  %v2809_v31 = vpack.c.bf16 %v598_v29, %v597_v28  ;;  %v600_v33 = vld [vmem:[%s3590_s6 + $0x28] sm:$0xff]  ;;  %v601_v36 = vld [vmem:[%s3590_s6 + $0x30] sm:$0xff]  ;;  %s3008_s9 = smov 104   ;;  %vm603_vm7 = vcmask 523264   ;;  %v3009_v50 = vmov 5  }
 0x1d4   : > { %v2805_v27 = vpack.c.bf16 %v596_v25, %v595_v24  ;;  %v599_v32 = vld [vmem:[%s3590_s6 + $0x20] sm:$0xff]  ;;  %2866 = vset.pattern.permute.xlu1 %v3004_v23  ;;  %v602_v37 = vld [vmem:[%s3590_s6 + $0x38] sm:$0xff]  ;;  %v3010_v51 = vmov 1   ;;  %v3011_v52 = vmov 3   ;;  %v3012_v53 = vmov 4   ;;  %s3015_s10 = smov 96  }
 0x1d5   : > { %v2813_v35 = vpack.c.bf16 %v600_v33, %v599_v32  ;;  %v2817_v38 = vpack.c.bf16 %v602_v37, %v601_v36  ;;  %933 = vrot.lane.b32.xlu1 %v3149_v26, %s3005_s29  ;;  %v3013_v54 = vmov 6   ;;  %v3014_v55 = vmov 7   ;;  %s3016_s11 = smov 88   ;;  %s3017_s13 = smov 80  }
 0x1d6   : > { %2806 = vmatprep.subr.bf16.mxu1 %v2805_v27  ;;  %2657 = vmatpush3.bf16.msra.mxu0 %v3149_v26  ;;  %v3201_v60 = vshrl.u32 %v695_v58, 7  ;;  %vm532_vm8 = vcmp.gt.bf16.partialorder %v3139_v22, 0  ;;  %v3209_v0 = vld [vmem:[#allocation3] sm:$0xff]  ;;  %vm531_vm13 = vcmp.gt.bf16.partialorder %v3132_v20, 0  ;;  %s3018_s14 = smov 72   ;;  %s3020_s12 = smov 16  }
 0x1d7   : > { %2808 = vmatpush3.bf16.msra.mxu1 %v2805_v27  ;;  %590 = vperm.xlu0 %2865, %v3159_v30   ;;  %v708_v2 = vsel %vm532_vm8, 65537, %v3004_v23  ;;  %s3021_s16 = smov 24   ;;  %s3022_s17 = smov 32  }
 0x1d8   : > { %2810 = vmatprep.subr.bf16.mxu1 %v2809_v31  ;;  %2681 = vmatprep.subr.bf16.mxu0 %v3002_v19  ;;  %v697_v62 = vsub.s32 0, %v3201_v60  ;;  %v1108_v1 = vsub.s32 2, %v3201_v60  ;;  %v710_v5 = vunpack.c.l.b16 %v708_v2  ;;  %v894_v7 = vsub.s32 1, %v3201_v60  ;;  %s3023_s18 = smov 40   ;;  %s3024_s19 = smov 48  }
 0x1d9   : > { %2659 = vmatmul.mubr.msk.bf16.vlgmr.msra.gmra.mrb[0].mxu0 %vm538_vm6, %v2523_v34  ;;  %1145 = vrot.lane.b32.xlu1 %v3149_v26, %s3007_s30  ;;  %v1744_v15 = vsub.s32 5, %v3201_v60  ;;  %v1320_v16 = vsub.s32 3, %v3201_v60  ;;  %v1532_v34 = vsub.s32 4, %v3201_v60  ;;  %s3025_s20 = smov 56   ;;  %p2551_p5 = scmp.ne.s32.totalorder %s3080_s28, 1 }
 0x1da   : > { %2682 = vmatpush3.bf16.msra.mxu0 %v3126_v18  ;;  %2685 = vmatprep.mubr.msk.bf16.mxu0 %vm3003_vm5, %v3002_v19  ;;  %v3216_v4 = vrot.slane %v3209_v0, %v697_v62  ;;  %v3219_v6 = vrot.slane %v3209_v0, %v1108_v1  ;;  %vm3223_vm9 = vcmp.ne.s32.totalorder %v710_v5, 0  ;;  %v895_v13 = vrot.slane %v3209_v0, %v894_v7 }
 0x1db   : > { %2812 = vmatpush3.bf16.msra.mxu1 %v2809_v31  ;;  %2683 = vmatprep.subr.bf16.mxu0 %v3002_v19  ;;  %v3236_v29 = vrot.slane %v3209_v0, %v1744_v15  ;;  %v3241_v32 = vrot.slane %v3209_v0, %v1320_v16 }
 0x1dc   : > { %2814 = vmatprep.subr.bf16.mxu1 %v2813_v35  ;;  %931 = vrot.lane.b32.xlu0 %v3126_v18, %s3005_s29 }
 0x1dd   : > { %2868 = vset.pattern.permute.xlu0 %v3006_v39  ;;  %1357 = vrot.lane.b32.xlu1 %v3149_v26, %s3008_s9 }
 0x1de   : > { %2684 = vmatpush3.bf16.msra.mxu0 %v3149_v26 }
 0x1df   : > { %2816 = vmatpush3.bf16.msra.mxu1 %v2813_v35  ;;  %2695 = vmatprep.subr.bf16.mxu0 %v3002_v19 }
 0x1e0   : > { %2818 = vmatprep.subr.bf16.mxu1 %v2817_v38  ;;  %1143 = vrot.lane.b32.xlu0 %v3126_v18, %s3007_s30 }
 0x1e3   : > { %2820 = vmatpush3.bf16.msra.mxu1 %v2817_v38 }
 0x1e4   : > { %1355 = vrot.lane.b32.xlu0 %v3126_v18, %s3008_s9 }
 0x247   : > { %v3197_v57 = vpop.permute.xlu1 %933 }
 0x24b   : > { %v3203_v61 = vpop.permute.xlu1 %1145 }
 0x24f   : > { %v3213_v3 = vpop.permute.xlu1 %1357 }
 0x252   : > { %v586_v40 = vpop.permute.xlu0 %585 }
 0x256   : > { %v591_v44 = vpop.permute.xlu0 %590 }
 0x25a   : > { %v3195_v56 = vpop.permute.xlu0 %931 }
 0x25e   : > { %v3199_v59 = vpop.permute.xlu0 %1143 }
 0x262   : > { %v3207_v63 = vpop.permute.xlu0 %1355 }
 0x2ac   : > { %v576_v41 = vpop.f32.mrb[0].mxu0 }
 0x2ad   : > { %v593_v42 = vmul.f32 %v586_v40, %v576_v41  ;;  %v2660_v43 = vpop.f32.mrb[1].mxu0 }
 0x2ae   : > { %v579_v45 = vpop.f32.mrb[2].mxu0 }
 0x2af   : > { %v594_v46 = vmul.f32 %v591_v44, %v579_v45  ;;  %v2661_v47 = vpop.f32.mrb[3].mxu0  ;;  %2678 = vmatprep.mubr.msk.f32.mxu1 %vm603_vm7, %v593_v42  ;;  %v707_v42 = vsel %vm531_vm13, 65537, %v3004_v23  ;;  %v1533_v44 = vrot.slane %v3209_v0, %v1532_v34 }
 0x2b0   : > { %v709_v47 = vunpack.c.l.b16 %v707_v42 }
 0x2b1   : > { %2679 = vmatmul.mubr.msk.f32.vlgmr.msra.gmra.mrb[0].mxu1 %vm603_vm7, %v594_v46  ;;  %v1956_v46 = vsub.s32 6, %v3201_v60 }
 0x2b2   : > { %vm3269_vm2 = vcmp.ne.s32.totalorder %v709_v47, 0 }
 0x384   : > { %v2680_v48 = vpop.f32.mrb[0].mxu1 }
 0x385   : > { %1103 = vperm.xlu0 %2868, %v2680_v48   ;;  %692 = vperm.xlu1 %2866, %v2680_v48   ;;  %v676_v49 = vpop.f32.mrb[1].mxu1 }
 0x389   : > { %2871 = vset.pattern.permute.xlu0 %v3009_v50  ;;  %2867 = vset.pattern.permute.xlu1 %v3010_v51 }
 0x38a   : > { %1739 = vperm.xlu0 %2871, %v2680_v48   ;;  %889 = vperm.xlu1 %2867, %v2680_v48  }
 0x38e   : > { %2875 = vset.pattern.permute.xlu0 %v3010_v51  ;;  %2869 = vset.pattern.permute.xlu1 %v3011_v52 }
 0x38f   : > { %1315 = vperm.xlu1 %2869, %v2680_v48   ;;  %885 = vperm.xlu0 %2875, %v676_v49  }
 0x393   : > { %2870 = vset.pattern.permute.xlu1 %v3012_v53  ;;  %2878 = vset.pattern.permute.xlu0 %v3012_v53 }
 0x394   : > { %1527 = vperm.xlu1 %2870, %v2680_v48   ;;  %1523 = vperm.xlu0 %2878, %v676_v49  }
 0x398   : > { %2872 = vset.pattern.permute.xlu1 %v3013_v54  ;;  %2881 = vset.pattern.permute.xlu0 %v3014_v55 }
 0x399   : > { %1951 = vperm.xlu1 %2872, %v2680_v48   ;;  %2159 = vperm.xlu0 %2881, %v676_v49  }
 0x39d   : > { %2873 = vset.pattern.permute.xlu1 %v3014_v55  ;;  %v3263_v55 = vrot.slane %v3209_v0, %v1956_v46 }
 0x39e   : > { %2163 = vperm.xlu1 %2873, %v2680_v48  }
 0x3a2   : > { %2874 = vset.pattern.permute.xlu1 %v3004_v23 }
 0x3a3   : > { %687 = vperm.xlu1 %2874, %v676_v49  }
 0x3a7   : > { %2876 = vset.pattern.permute.xlu1 %v3006_v39 }
 0x3a8   : > { %1099 = vperm.xlu1 %2876, %v676_v49  }
 0x3ac   : > { %2877 = vset.pattern.permute.xlu1 %v3011_v52 }
 0x3ad   : > { %1311 = vperm.xlu1 %2877, %v676_v49  }
 0x3b1   : > { %2879 = vset.pattern.permute.xlu1 %v3009_v50 }
 0x3b2   : > { %1735 = vperm.xlu1 %2879, %v676_v49  }
 0x3b6   : > { %2880 = vset.pattern.permute.xlu1 %v3013_v54 }
 0x3b7   : > { %1947 = vperm.xlu1 %2880, %v676_v49  }
 0x404   : > { %v1104_v8 = vpop.permute.xlu0 %1103  ;;  %v693_v9 = vpop.permute.xlu1 %692 }
 0x405   : > { %v700_v10 = vadd.f32 %v3216_v4, %v693_v9  ;;  %v1111_v12 = vadd.f32 %v3219_v6, %v1104_v8 }
 0x407   : > { %v704_v14 = vmul.f32 0.2, %v700_v10  ;;  %vm702_vm10 = vcmp.gt.f32.partialorder %v700_v10, 0.0  ;;  %v1115_v25 = vmul.f32 0.2, %v1111_v12  ;;  %vm1113_vm11 = vcmp.gt.f32.partialorder %v1111_v12, 0.0 }
 0x409   : > { %v1740_v17 = vpop.permute.xlu0 %1739  ;;  %v890_v22 = vpop.permute.xlu1 %889  ;;  %v706_v24 = vsel %vm702_vm10, %v700_v10, %v704_v14  ;;  %v1117_v38 = vsel %vm1113_vm11, %v1111_v12, %v1115_v25 }
 0x40a   : > { %v897_v27 = vadd.f32 %v895_v13, %v890_v22  ;;  %v3233_v28 = vsel %vm3223_vm9, %v706_v24, -1e+30  ;;  %v1747_v39 = vadd.f32 %v3236_v29, %v1740_v17  ;;  %v3257_v45 = vsel %vm3223_vm9, %v1117_v38, -1e+30 }
 0x40b   : > { %v718_v31 = vsel %vm538_vm6, %v3233_v28, -inf  ;;  %v1123_v54 = vsel %vm538_vm6, %v3257_v45, -inf }
 0x40c   : > { %v901_v33 = vmul.f32 0.2, %v897_v27  ;;  %719 = vmax.xlane.f32.xlu0 %v718_v31  ;;  %vm899_vm12 = vcmp.gt.f32.partialorder %v897_v27, 0.0  ;;  %v1751_v48 = vmul.f32 0.2, %v1747_v39  ;;  %vm1749_vm15 = vcmp.gt.f32.partialorder %v1747_v39, 0.0 }
 0x40e   : > { %v1316_v35 = vpop.permute.xlu1 %1315  ;;  %v886_v36 = vpop.permute.xlu0 %885  ;;  %v903_v37 = vsel %vm899_vm12, %v897_v27, %v901_v33  ;;  %v1753_v5 = vsel %vm1749_vm15, %v1747_v39, %v1751_v48 }
 0x40f   : > { %v1323_v40 = vadd.f32 %v3241_v32, %v1316_v35  ;;  %v3249_v41 = vsel %vm3223_vm9, %v903_v37, -1e+30  ;;  %v896_v7 = vadd.f32 %v895_v13, %v886_v36  ;;  %v3288_v22 = vsel %vm3223_vm9, %v1753_v5, -1e+30 }
 0x410   : > { %v909_v43 = vsel %vm538_vm6, %v3249_v41, -inf  ;;  %v1759_v31 = vsel %vm538_vm6, %v3288_v22, -inf }
 0x411   : > { %v1327_v20 = vmul.f32 0.2, %v1323_v40  ;;  %910 = vmax.xlane.f32.xlu1 %v909_v43  ;;  %vm1325_vm14 = vcmp.gt.f32.partialorder %v1323_v40, 0.0  ;;  %v900_v24 = vmul.f32 0.2, %v896_v7  ;;  %vm898_vm4 = vcmp.gt.f32.partialorder %v896_v7, 0.0 }
 0x413   : > { %v1528_v49 = vpop.permute.xlu1 %1527  ;;  %v1524_v50 = vpop.permute.xlu0 %1523  ;;  %v1329_v51 = vsel %vm1325_vm14, %v1323_v40, %v1327_v20  ;;  %v902_v34 = vsel %vm898_vm4, %v896_v7, %v900_v24  ;;  %vm2153_vm4 = vcmask 458112  }
 0x414   : > { %v1535_v52 = vadd.f32 %v1533_v44, %v1528_v49  ;;  %v1534_v53 = vadd.f32 %v1533_v44, %v1524_v50  ;;  %v3267_v58 = vsel %vm3223_vm9, %v1329_v51, -1e+30  ;;  %v3301_v38 = vsel %vm3269_vm2, %v902_v34, -1e+30 }
 0x415   : > { %1124 = vmax.xlane.f32.xlu1 %v1123_v54  ;;  %v1335_v9 = vsel %vm538_vm6, %v3267_v58, -inf  ;;  %v906_v40 = vsel %vm538_vm6, %v3301_v38, -inf }
 0x416   : > { %v1539_v62 = vmul.f32 0.2, %v1535_v52  ;;  %v1538_v1 = vmul.f32 0.2, %v1534_v53  ;;  %vm1537_vm0 = vcmp.gt.f32.partialorder %v1535_v52, 0.0  ;;  %vm1536_vm1 = vcmp.gt.f32.partialorder %v1534_v53, 0.0 }
 0x418   : > { %v1952_v8 = vpop.permute.xlu1 %1951  ;;  %v1541_v10 = vsel %vm1537_vm0, %v1535_v52, %v1539_v62  ;;  %v1540_v12 = vsel %vm1536_vm1, %v1534_v53, %v1538_v1  ;;  %vm1305_vm0 = vcmask 195712   ;;  %vm1517_vm1 = vcmask 261312  }
 0x419   : > { %v1959_v14 = vadd.f32 %v3263_v55, %v1952_v8  ;;  %1336 = vmax.xlane.f32.xlu1 %v1335_v9  ;;  %v3278_v15 = vsel %vm3223_vm9, %v1541_v10, -1e+30  ;;  %v3282_v16 = vsel %vm3269_vm2, %v1540_v12, -1e+30 }
 0x41a   : > { %v1547_v13 = vsel %vm538_vm6, %v3278_v15, -inf  ;;  %v1544_v24 = vsel %vm538_vm6, %v3282_v16, -inf }
 0x41b   : > { %v1963_v17 = vmul.f32 0.2, %v1959_v14  ;;  %1548 = vmax.xlane.f32.xlu0 %v1547_v13  ;;  %vm1961_vm3 = vcmp.gt.f32.partialorder %v1959_v14, 0.0 }
 0x41d   : > { %v2164_v25 = vpop.permute.xlu1 %2163  ;;  %v1965_v27 = vsel %vm1961_vm3, %v1959_v14, %v1963_v17  ;;  %vm1941_vm3 = vcmask 392512  }
 0x41e   : > { %v3294_v33 = vsel %vm3223_vm9, %v1965_v27, -1e+30 }
 0x41f   : > { %1760 = vmax.xlane.f32.xlu0 %v1759_v31  ;;  %v1971_v36 = vsel %vm538_vm6, %v3294_v33, -inf }
 0x422   : > { %v688_v35 = vpop.permute.xlu1 %687 }
 0x423   : > { %v699_v37 = vadd.f32 %v3216_v4, %v688_v35  ;;  %1972 = vmax.xlane.f32.xlu0 %v1971_v36 }
 0x425   : > { %v703_v39 = vmul.f32 0.2, %v699_v37  ;;  %vm701_vm8 = vcmp.gt.f32.partialorder %v699_v37, 0.0 }
 0x427   : > { %v1100_v42 = vpop.permute.xlu1 %1099  ;;  %907 = vmax.xlane.f32.xlu0 %v906_v40  ;;  %v705_v43 = vsel %vm701_vm8, %v699_v37, %v703_v39  ;;  %vm2365_vm8 = vcmask 523712  }
 0x428   : > { %v1110_v44 = vadd.f32 %v3219_v6, %v1100_v42  ;;  %v3308_v20 = vsel %vm3269_vm2, %v705_v43, -1e+30 }
 0x429   : > { %v715_v4 = vsel %vm538_vm6, %v3308_v20, -inf }
 0x42a   : > { %v1114_v46 = vmul.f32 0.2, %v1110_v44  ;;  %716 = vmax.xlane.f32.xlu1 %v715_v4  ;;  %vm1112_vm10 = vcmp.gt.f32.partialorder %v1110_v44, 0.0 }
 0x42c   : > { %v1312_v47 = vpop.permute.xlu1 %1311  ;;  %v1116_v48 = vsel %vm1112_vm10, %v1110_v44, %v1114_v46 }
 0x42d   : > { %v1322_v49 = vadd.f32 %v3241_v32, %v1312_v47  ;;  %v3315_v50 = vsel %vm3269_vm2, %v1116_v48, -1e+30 }
 0x42e   : > { %v1120_v6 = vsel %vm538_vm6, %v3315_v50, -inf }
 0x42f   : > { %v1326_v51 = vmul.f32 0.2, %v1322_v49  ;;  %1121 = vmax.xlane.f32.xlu0 %v1120_v6  ;;  %vm1324_vm11 = vcmp.gt.f32.partialorder %v1322_v49, 0.0 }
 0x431   : > { %v1736_v52 = vpop.permute.xlu1 %1735  ;;  %v1328_v53 = vsel %vm1324_vm11, %v1322_v49, %v1326_v51 }
 0x432   : > { %v1746_v54 = vadd.f32 %v3236_v29, %v1736_v52  ;;  %v3322_v62 = vsel %vm3269_vm2, %v1328_v53, -1e+30 }
 0x433   : > { %v1332_v32 = vsel %vm538_vm6, %v3322_v62, -inf }
 0x434   : > { %v1750_v1 = vmul.f32 0.2, %v1746_v54  ;;  %1333 = vmax.xlane.f32.xlu0 %v1332_v32  ;;  %vm1748_vm12 = vcmp.gt.f32.partialorder %v1746_v54, 0.0 }
 0x436   : > { %v1948_v5 = vpop.permute.xlu1 %1947  ;;  %v1752_v7 = vsel %vm1748_vm12, %v1746_v54, %v1750_v1 }
 0x437   : > { %v1958_v8 = vadd.f32 %v3263_v55, %v1948_v5  ;;  %v3329_v9 = vsel %vm3269_vm2, %v1752_v7, -1e+30  ;;  %v2168_v55 = vsub.s32 7, %v3201_v60  ;;  %v2160_v60 = vpop.permute.xlu0 %2159 }
 0x438   : > { %v1756_v11 = vsel %vm538_vm6, %v3329_v9, -inf }
 0x439   : > { %v1962_v10 = vmul.f32 0.2, %v1958_v8  ;;  %vm1960_vm13 = vcmp.gt.f32.partialorder %v1958_v8, 0.0  ;;  %v2169_v14 = vrot.slane %v3209_v0, %v2168_v55 }
 0x43b   : > { %1569 = vrot.lane.b32.xlu1 %v3149_v26, %s3015_s10  ;;  %v1964_v29 = vsel %vm1960_vm13, %v1958_v8, %v1962_v10  ;;  %v2171_v13 = vadd.f32 %v2169_v14, %v2164_v25  ;;  %v2170_v0 = vadd.f32 %v2169_v14, %v2160_v60 }
 0x43c   : > { %v3334_v12 = vsel %vm3269_vm2, %v1964_v29, -1e+30 }
 0x43d   : > { %v2175_v17 = vmul.f32 0.2, %v2171_v13  ;;  %vm2173_vm14 = vcmp.gt.f32.partialorder %v2171_v13, 0.0  ;;  %v2174_v25 = vmul.f32 0.2, %v2170_v0  ;;  %vm2172_vm15 = vcmp.gt.f32.partialorder %v2170_v0, 0.0 }
 0x43e   : > { %v1968_v39 = vsel %vm538_vm6, %v3334_v12, -inf }
 0x43f   : > { %1781 = vrot.lane.b32.xlu1 %v3149_v26, %s3016_s11  ;;  %v2177_v27 = vsel %vm2173_vm14, %v2171_v13, %v2175_v17  ;;  %v2176_v36 = vsel %vm2172_vm15, %v2170_v0, %v2174_v25 }
 0x440   : > { %v3344_v31 = vsel %vm3223_vm9, %v2177_v27, -1e+30  ;;  %vm1093_vm9 = vcmask 130112  }
 0x441   : > { %v2183_v34 = vsel %vm538_vm6, %v3344_v31, -inf }
 0x44a   : > { %1567 = vrot.lane.b32.xlu0 %v3126_v18, %s3015_s10 }
 0x463   : > { %1545 = vmax.xlane.f32.xlu1 %v1544_v24 }
 0x469   : > { %2184 = vmax.xlane.f32.xlu0 %v2183_v34 }
 0x474   : > { %1991 = vrot.lane.b32.xlu1 %v3126_v18, %s3017_s13 }
 0x47f   : > { %1779 = vrot.lane.b32.xlu0 %v3126_v18, %s3016_s11 }
 0x483   : > { %1993 = vrot.lane.b32.xlu0 %v3149_v26, %s3017_s13 }
 0x487   : > { %2205 = vrot.lane.b32.xlu0 %v3149_v26, %s3018_s14  ;;  %v3359_v26 = vsel %vm3269_vm2, %v2176_v36, -1e+30  ;;  %vm1729_vm2 = vcmask 326912  }
 0x488   : > { %v2180_v42 = vsel %vm538_vm6, %v3359_v26, -inf }
 0x498   : > { %1757 = vmax.xlane.f32.xlu1 %v1756_v11 }
 0x499   : > { %v720_v35 = vpop.xlane.xlu0 %719 }
 0x49a   : > { %v722_v37 = vsub.f32 %v3233_v28, %v720_v35 }
 0x49c   : > { %v725_v40 = vmul.f32 1.442695, %v722_v37  ;;  %1969 = vmax.xlane.f32.xlu1 %v1968_v39 }
 0x49e   : > { %2885 = vpow2.f32 %v725_v40  ;;  %v911_v43 = vpop.xlane.xlu1 %910 }
 0x49f   : > { %v913_v32 = vsub.f32 %v3249_v41, %v911_v43 }
 0x4a0   : > { %2181 = vmax.xlane.f32.xlu1 %v2180_v42 }
 0x4a1   : > { %v916_v8 = vmul.f32 1.442695, %v913_v32 }
 0x4a2   : > { %v1125_v47 = vpop.xlane.xlu1 %1124 }
 0x4a6   : > { %v1337_v2 = vpop.xlane.xlu1 %1336 }
 0x4a8   : > { %v2886_v44 = vpop.eup %2885  ;;  %v1549_v4 = vpop.xlane.xlu0 %1548 }
 0x4a9   : > { %v730_v46 = vsel %vm538_vm6, %v2886_v44, 0.0  ;;  %v1551_v27 = vsub.f32 %v3278_v15, %v1549_v4 }
 0x4aa   : > { %731 = vadd.xlane.f32.xlu0 %v730_v46 }
 0x4ab   : > { %v1554_v60 = vmul.f32 1.442695, %v1551_v27 }
 0x4ac   : > { %v1761_v28 = vpop.xlane.xlu0 %1760 }
 0x4b0   : > { %v3364_v48 = vpop.xlane.xlu0 %1972 }
 0x4b1   : > { %2203 = vrot.lane.b32.xlu1 %v3126_v18, %s3018_s14 }
 0x4b4   : > { %v908_v49 = vpop.xlane.xlu0 %907 }
 0x4b5   : > { %v912_v6 = vsub.f32 %v3301_v38, %v908_v49  ;;  %v1127_v38 = vsub.f32 %v3257_v45, %v1125_v47  ;;  %v1339_v45 = vsub.f32 %v3267_v58, %v1337_v2 }
 0x4b7   : > { %v914_v51 = vmul.f32 1.442695, %v912_v6  ;;  %v717_v52 = vpop.xlane.xlu1 %716  ;;  %v1130_v13 = vmul.f32 1.442695, %v1127_v38  ;;  %v1342_v24 = vmul.f32 1.442695, %v1339_v45 }
 0x4b8   : > { %v721_v53 = vsub.f32 %v3308_v20, %v717_v52 }
 0x4b9   : > { %2887 = vpow2.f32 %v914_v51 }
 0x4ba   : > { %v723_v54 = vmul.f32 1.442695, %v721_v53 }
 0x4bb   : > { %v1570_v42 = vpop.permute.xlu1 %1569 }
 0x4bc   : > { %2889 = vpow2.f32 %v723_v54  ;;  %v1122_v1 = vpop.xlane.xlu0 %1121 }
 0x4bd   : > { %v1126_v5 = vsub.f32 %v3315_v50, %v1122_v1 }
 0x4bf   : > { %v1128_v7 = vmul.f32 1.442695, %v1126_v5  ;;  %v1782_v4 = vpop.permute.xlu1 %1781 }
 0x4c1   : > { %2891 = vpow2.f32 %v1128_v7  ;;  %v1334_v18 = vpop.xlane.xlu0 %1333 }
 0x4c2   : > { %v1338_v10 = vsub.f32 %v3322_v62, %v1334_v18  ;;  %2893 = vpow2.f32 %v916_v8 }
 0x4c3   : > { %v2888_v29 = vpop.eup %2887 }
 0x4c4   : > { %v1340_v55 = vmul.f32 1.442695, %v1338_v10  ;;  %v918_v20 = vsel %vm538_vm6, %v2888_v29, 0.0 }
 0x4c5   : > { %919 = vadd.xlane.f32.xlu0 %v918_v20  ;;  %v1568_v36 = vpop.permute.xlu0 %1567 }
 0x4c6   : > { %v2890_v14 = vpop.eup %2889  ;;  %2895 = vpow2.f32 %v1340_v55 }
 0x4c7   : > { %v3374_v41 = vpack.c.bf16 %v2886_v44, %v2890_v14  ;;  %2897 = vpow2.f32 %v1130_v13  ;;  %v727_v15 = vsel %vm538_vm6, %v2890_v14, 0.0 }
 0x4c8   : > { %2899 = vpow2.f32 %v1342_v24 }
 0x4c9   : > { %2686 = vmatmul.mubr.msk.bf16.vlgmr.msra.gmra.mrb[4].mxu0 %vm538_vm6, %v3374_v41  ;;  %2901 = vpow2.f32 %v1554_v60 }
 0x4ca   : > { %2696 = vmatpush3.bf16.msra.mxu0 %v3195_v56  ;;  %2699 = vmatprep.mubr.msk.bf16.mxu0 %vm3003_vm5, %v3002_v19 }
 0x4cb   : > { %v2892_v50 = vpop.eup %2891  ;;  %2697 = vmatprep.subr.bf16.mxu0 %v3002_v19 }
 0x4cc   : > { %v1132_v62 = vsel %vm538_vm6, %v2892_v50, 0.0  ;;  %v2894_v17 = vpop.eup %2893 }
 0x4cd   : > { %1133 = vadd.xlane.f32.xlu0 %v1132_v62  ;;  %v3387_v56 = vpack.c.bf16 %v2894_v17, %v2888_v29 }
 0x4ce   : > { %2698 = vmatpush3.bf16.msra.mxu0 %v3197_v57  ;;  %v1763_v57 = vsub.f32 %v3288_v22, %v1761_v28  ;;  %v921_v22 = vsel %vm538_vm6, %v2894_v17, 0.0 }
 0x4cf   : > { %2709 = vmatprep.subr.bf16.mxu0 %v3002_v19 }
 0x4d0   : > { %v2896_v34 = vpop.eup %2895  ;;  %v1766_v25 = vmul.f32 1.442695, %v1763_v57 }
 0x4d1   : > { %2700 = vmatmul.mubr.msk.bf16.vlgmr.msra.gmra.mrb[8].mxu0 %vm538_vm6, %v3387_v56  ;;  %v1344_v58 = vsel %vm538_vm6, %v2896_v34, 0.0  ;;  %v2898_v0 = vpop.eup %2897 }
 0x4d2   : > { %2710 = vmatpush3.bf16.msra.mxu0 %v3199_v59  ;;  %1345 = vadd.xlane.f32.xlu0 %v1344_v58  ;;  %v1975_v59 = vsub.f32 %v3294_v33, %v3364_v48  ;;  %v3402_v11 = vpack.c.bf16 %v2898_v0, %v2892_v50  ;;  %2903 = vpow2.f32 %v1766_v25  ;;  %v1135_v33 = vsel %vm538_vm6, %v2898_v0, 0.0  ;;  %v2900_v35 = vpop.eup %2899 }
 0x4d3   : > { %2711 = vmatprep.subr.bf16.mxu0 %v3002_v19  ;;  %2713 = vmatprep.mubr.msk.bf16.mxu0 %vm3003_vm5, %v3002_v19  ;;  %v3414_v37 = vpack.c.bf16 %v2900_v35, %v2896_v34  ;;  %v2902_v39 = vpop.eup %2901 }
 0x4d5   : > { %728 = vadd.xlane.f32.xlu1 %v727_v15 }
 0x4d6   : > { %2712 = vmatpush3.bf16.msra.mxu0 %v3203_v61  ;;  %v1978_v61 = vmul.f32 1.442695, %v1975_v59 }
 0x4d7   : > { %2723 = vmatprep.subr.bf16.mxu0 %v3002_v19 }
 0x4d8   : > { %2905 = vpow2.f32 %v1978_v61 }
 0x4d9   : > { %2714 = vmatmul.mubr.msk.bf16.vlgmr.msra.gmra.mrb[12].mxu0 %vm538_vm6, %v3402_v11  ;;  %922 = vadd.xlane.f32.xlu1 %v921_v22 }
 0x4da   : > { %2724 = vmatpush3.bf16.msra.mxu0 %v3207_v63  ;;  %2727 = vmatprep.mubr.msk.bf16.mxu0 %vm3003_vm5, %v3002_v19  ;;  %v1347_v63 = vsel %vm538_vm6, %v2900_v35, 0.0 }
 0x4db   : > { %2725 = vmatprep.subr.bf16.mxu0 %v3002_v19 }
 0x4dc   : > { %v2904_v40 = vpop.eup %2903 }
 0x4dd   : > { %1136 = vadd.xlane.f32.xlu1 %v1135_v33  ;;  %v1771_v43 = vsel %vm538_vm6, %v2904_v40, 0.0 }
 0x4de   : > { %2726 = vmatpush3.bf16.msra.mxu0 %v3213_v3  ;;  %v1559_v3 = vsel %vm538_vm6, %v2902_v39, 0.0 }
 0x4df   : > { %2737 = vmatprep.subr.bf16.mxu0 %v3002_v19 }
 0x4e1   : > { %2728 = vmatmul.mubr.msk.bf16.vlgmr.msra.gmra.mrb[16].mxu0 %vm538_vm6, %v3414_v37  ;;  %1348 = vadd.xlane.f32.xlu1 %v1347_v63 }
 0x4e2   : > { %2738 = vmatpush3.bf16.msra.mxu0 %v1568_v36  ;;  %2741 = vmatprep.mubr.msk.bf16.mxu0 %vm3003_vm5, %v3002_v19  ;;  %v2906_v44 = vpop.eup %2905 }
 0x4e3   : > { %2739 = vmatprep.subr.bf16.mxu0 %v3002_v19  ;;  %v1983_v46 = vsel %vm538_vm6, %v2906_v44, 0.0 }
 0x4e5   : > { %1560 = vadd.xlane.f32.xlu1 %v1559_v3 }
 0x4e6   : > { %2740 = vmatpush3.bf16.msra.mxu0 %v1570_v42 }
 0x4e7   : > { %2751 = vmatprep.subr.bf16.mxu0 %v3002_v19 }
 0x4e9   : > { %1772 = vadd.xlane.f32.xlu1 %v1771_v43 }
 0x4ed   : > { %1984 = vadd.xlane.f32.xlu1 %v1983_v46 }
 0x4f0   : > { %v1546_v28 = vpop.xlane.xlu1 %1545 }
 0x4f1   : > { %v1550_v47 = vsub.f32 %v3282_v16, %v1546_v28 }
 0x4f3   : > { %v1552_v48 = vmul.f32 1.442695, %v1550_v47 }
 0x4f4   : > { %v1992_v32 = vpop.permute.xlu1 %1991 }
 0x4f5   : > { %2907 = vpow2.f32 %v1552_v48 }
 0x4f6   : > { %v2185_v2 = vpop.xlane.xlu0 %2184 }
 0x4f7   : > { %v2187_v49 = vsub.f32 %v3344_v31, %v2185_v2 }
 0x4f9   : > { %v2190_v6 = vmul.f32 1.442695, %v2187_v49 }
 0x4fa   : > { %v1780_v52 = vpop.permute.xlu0 %1779 }
 0x4fb   : > { %2909 = vpow2.f32 %v2190_v6 }
 0x4fe   : > { %v1994_v10 = vpop.permute.xlu0 %1993 }
 0x4ff   : > { %v2908_v51 = vpop.eup %2907 }
 0x500   : > { %v1556_v53 = vsel %vm538_vm6, %v2908_v51, 0.0  ;;  %v3429_v54 = vpack.c.bf16 %v2902_v39, %v2908_v51 }
 0x501   : > { %1557 = vadd.xlane.f32.xlu0 %v1556_v53 }
 0x502   : > { %2742 = vmatmul.mubr.msk.bf16.vlgmr.msra.gmra.mrb[20].mxu0 %vm538_vm6, %v3429_v54  ;;  %v2206_v14 = vpop.permute.xlu0 %2205 }
 0x503   : > { %2752 = vmatpush3.bf16.msra.mxu0 %v1780_v52  ;;  %2755 = vmatprep.mubr.msk.bf16.mxu0 %vm3003_vm5, %v3002_v19 }
 0x504   : > { %2753 = vmatprep.subr.bf16.mxu0 %v3002_v19 }
 0x505   : > { %v2910_v16 = vpop.eup %2909 }
 0x506   : > { %v2195_v31 = vsel %vm538_vm6, %v2910_v16, 0.0 }
 0x507   : > { %2754 = vmatpush3.bf16.msra.mxu0 %v1782_v4  ;;  %2196 = vadd.xlane.f32.xlu1 %v2195_v31 }
 0x508   : > { %2765 = vmatprep.subr.bf16.mxu0 %v3002_v19 }
 0x525   : > { %v1758_v1 = vpop.xlane.xlu1 %1757 }
 0x526   : > { %v1762_v5 = vsub.f32 %v3329_v9, %v1758_v1 }
 0x528   : > { %v1764_v7 = vmul.f32 1.442695, %v1762_v5 }
 0x529   : > { %v1970_v8 = vpop.xlane.xlu1 %1969 }
 0x52a   : > { %2911 = vpow2.f32 %v1764_v7  ;;  %v1974_v18 = vsub.f32 %v3334_v12, %v1970_v8 }
 0x52c   : > { %v1976_v29 = vmul.f32 1.442695, %v1974_v18 }
 0x52d   : > { %v2182_v38 = vpop.xlane.xlu1 %2181 }
 0x52e   : > { %2913 = vpow2.f32 %v1976_v29  ;;  %v2186_v55 = vsub.f32 %v3359_v26, %v2182_v38 }
 0x530   : > { %v2188_v20 = vmul.f32 1.442695, %v2186_v55 }
 0x531   : > { %v2204_v24 = vpop.permute.xlu1 %2203 }
 0x532   : > { %2915 = vpow2.f32 %v2188_v20 }
 0x534   : > { %v2912_v13 = vpop.eup %2911  ;;  %799 = vxpose.xlu1.c.b16.start.end [1/1] (short) (narrow) %v3374_v41, 32 }
 0x535   : > { %v1768_v50 = vsel %vm538_vm6, %v2912_v13, 0.0  ;;  %v3443_v9 = vpack.c.bf16 %v2904_v40, %v2912_v13 }
 0x536   : > { %1769 = vadd.xlane.f32.xlu0 %v1768_v50 }
 0x537   : > { %v732_v45 = vpop.xlane.xlu0 %731  ;;  %2756 = vmatmul.mubr.msk.bf16.vlgmr.msra.gmra.mrb[24].mxu0 %vm538_vm6, %v3443_v9 }
 0x538   : > { %v2914_v12 = vpop.eup %2913  ;;  %2917 = vrcp.f32 %v732_v45  ;;  %2766 = vmatpush3.bf16.msra.mxu0 %v1992_v32  ;;  %2769 = vmatprep.mubr.msk.bf16.mxu0 %vm3003_vm5, %v3002_v19 }
 0x539   : > { %1210 = vxpose.xlu1.c.b16.start.end [1/1] (short) (narrow) %v3402_v11, 32  ;;  %v1980_v26 = vsel %vm538_vm6, %v2914_v12, 0.0  ;;  %2767 = vmatprep.subr.bf16.mxu0 %v3002_v19  ;;  %v3453_v17 = vpack.c.bf16 %v2906_v44, %v2914_v12 }
 0x53a   : > { %1981 = vadd.xlane.f32.xlu0 %v1980_v26 }
 0x53c   : > { %v2916_v41 = vpop.eup %2915  ;;  %2768 = vmatpush3.bf16.msra.mxu0 %v1994_v10  ;;  %v2949_v10 = vld [vmem:[%s3093_s15] sm:$0xff] }
 0x53d   : > { %v2192_v62 = vsel %vm538_vm6, %v2916_v41, 0.0  ;;  %2779 = vmatprep.subr.bf16.mxu0 %v3002_v19  ;;  %2882 = vset.pattern.permute.xlu1 %v3004_v23  ;;  %v3463_v60 = vpack.c.bf16 %v2910_v16, %v2916_v41 }
 0x53e   : > { %2193 = vadd.xlane.f32.xlu0 %v2192_v62 }
 0x53f   : > { %2770 = vmatmul.mubr.msk.bf16.vlgmr.msra.gmra.mrb[28].mxu0 %vm538_vm6, %v3453_v17 }
 0x540   : > { %2780 = vmatpush3.bf16.msra.mxu0 %v2204_v24  ;;  %2783 = vmatprep.mubr.msk.bf16.mxu0 %vm3003_vm5, %v3002_v19  ;;  %vm815_vm5 = vcmask 130048  }
 0x541   : > { %2781 = vmatprep.subr.bf16.mxu0 %v3002_v19 }
 0x542   : > { %v2918_v27 = vpop.eup %2917 }
 0x543   : > { %v783_v34 = vmul.f32 %v2918_v27, %v2918_v27 }
 0x544   : > { %2782 = vmatpush3.bf16.msra.mxu0 %v2206_v14 }
 0x545   : > { %v785_v58 = vmul.f32 %v783_v34, %v3159_v30 }
 0x547   : > { %793 = vperm.xlu1 %2882, %v785_v58   ;;  %2784 = vmatmul.mubr.msk.bf16.vlgmr.msra.gmra.mrb[32].mxu0 %vm538_vm6, %v3463_v60  ;;  %vm879_vm6 = vcmask 64512  }
 0x552   : > { %v920_v15 = vpop.xlane.xlu0 %919 }
 0x553   : > { %2919 = vrcp.f32 %v920_v15 }
 0x55a   : > { %v1134_v19 = vpop.xlane.xlu0 %1133 }
 0x55d   : > { %v2920_v11 = vpop.eup %2919 }
 0x55e   : > { %v981_v35 = vmul.f32 %v2920_v11, %v2920_v11 }
 0x55f   : > { %v1346_v36 = vpop.xlane.xlu0 %1345 }
 0x560   : > { %v983_v3 = vmul.f32 %v981_v35, %v3135_v21 }
 0x562   : > { %v729_v57 = vpop.xlane.xlu1 %728 }
 0x566   : > { %v923_v0 = vpop.xlane.xlu1 %922 }
 0x567   : > { %2921 = vrcp.f32 %v923_v0 }
 0x56a   : > { %v1137_v25 = vpop.xlane.xlu1 %1136 }
 0x56b   : > { %2923 = vrcp.f32 %v1137_v25  ;;  %998 = vxpose.xlu0.c.b16.start.end [1/1] (short) (narrow) %v3387_v56, 32 }
 0x56c   : > { %2925 = vrcp.f32 %v1134_v19 }
 0x56d   : > { %2927 = vrcp.f32 %v729_v57 }
 0x56e   : > { %v1349_v59 = vpop.xlane.xlu1 %1348 }
 0x56f   : > { %2929 = vrcp.f32 %v1349_v59 }
 0x571   : > { %v2922_v22 = vpop.eup %2921 }
 0x572   : > { %v982_v61 = vmul.f32 %v2922_v22, %v2922_v22  ;;  %v1561_v33 = vpop.xlane.xlu1 %1560  ;;  %v2950_v22 = vld [vmem:[%s3093_s15 + $0x8] sm:$0xff]  ;;  %s3019_s15 = smov 8  }
 0x573   : > { %2931 = vrcp.f32 %v1561_v33 }
 0x574   : > { %v984_v63 = vmul.f32 %v982_v61, %v3159_v30  ;;  %2883 = vset.pattern.permute.xlu0 %v3004_v23  ;;  %2933 = vrcp.f32 %v1346_v36 }
 0x575   : > { %v2924_v39 = vpop.eup %2923 }
 0x576   : > { %992 = vperm.xlu1 %2882, %v984_v63   ;;  %v1194_v56 = vmul.f32 %v2924_v39, %v2924_v39  ;;  %v2926_v40 = vpop.eup %2925  ;;  %v1773_v16 = vpop.xlane.xlu1 %1772 }
 0x577   : > { %v2928_v42 = vpop.eup %2927  ;;  %v1193_v44 = vmul.f32 %v2926_v40, %v2926_v40 }
 0x578   : > { %v1196_v4 = vmul.f32 %v1194_v56, %v3159_v30  ;;  %v782_v47 = vmul.f32 %v2928_v42, %v2928_v42 }
 0x579   : > { %v2930_v43 = vpop.eup %2929  ;;  %v1195_v23 = vmul.f32 %v1193_v44, %v3135_v21 }
 0x57a   : > { %987 = vperm.xlu1 %2882, %v983_v3   ;;  %v1406_v48 = vmul.f32 %v2930_v43, %v2930_v43  ;;  %v784_v52 = vmul.f32 %v782_v47, %v3135_v21  ;;  %v1985_v32 = vpop.xlane.xlu1 %1984 }
 0x57c   : > { %v1408_v51 = vmul.f32 %v1406_v48, %v3159_v30 }
 0x57d   : > { %v2932_v46 = vpop.eup %2931 }
 0x57e   : > { %v1618_v28 = vmul.f32 %v2932_v46, %v2932_v46  ;;  %1204 = vperm.xlu1 %2882, %v1196_v4   ;;  %v2934_v49 = vpop.eup %2933 }
 0x57f   : > { %v1405_v6 = vmul.f32 %v2934_v49, %v2934_v49 }
 0x580   : > { %v1620_v2 = vmul.f32 %v1618_v28, %v3159_v30 }
 0x581   : > { %v1407_v53 = vmul.f32 %v1405_v6, %v3135_v21 }
 0x582   : > { %1199 = vperm.xlu1 %2882, %v1195_v23   ;;  %1628 = vperm.xlu0 %2883, %v1620_v2  }
 0x586   : > { %1416 = vperm.xlu1 %2882, %v1408_v51   ;;  %788 = vperm.xlu0 %2883, %v784_v52  }
 0x58a   : > { %1411 = vperm.xlu1 %2882, %v1407_v53  }
 0x58e   : > { %v1558_v31 = vpop.xlane.xlu0 %1557 }
 0x58f   : > { %2935 = vrcp.f32 %v1558_v31 }
 0x594   : > { %v2197_v1 = vpop.xlane.xlu1 %2196 }
 0x595   : > { %2937 = vrcp.f32 %v2197_v1 }
 0x596   : > { %2939 = vrcp.f32 %v1773_v16 }
 0x597   : > { %2941 = vrcp.f32 %v1985_v32 }
 0x599   : > { %v2936_v5 = vpop.eup %2935 }
 0x59a   : > { %v1617_v7 = vmul.f32 %v2936_v5, %v2936_v5  ;;  %v807_v8 = vpop.trf.xlu1 }
 0x59b   : > { %2691 = vmatprep.mubr.msk.bf16.mxu1 %vm815_vm5, %v807_v8 }
 0x59c   : > { %v3478_v18 = vpop.f32.mrb[4].mxu0  ;;  %v1619_v29 = vmul.f32 %v2949_v10, %v1617_v7 }
 0x59d   : > { %v2687_v38 = vpop.f32.mrb[5].mxu0 }
 0x59e   : > { %v3481_v55 = vpop.f32.mrb[6].mxu0  ;;  %1623 = vperm.xlu0 %2883, %v1619_v29   ;;  %v808_v47 = vpop.trf.xlu1 }
 0x59f   : > { %v2938_v21 = vpop.eup %2937  ;;  %v2688_v20 = vpop.f32.mrb[7].mxu0 }
 0x5a0   : > { %v2254_v14 = vmul.f32 %v2938_v21, %v2938_v21 }
 0x5a2   : > { %v2256_v13 = vmul.f32 %v2254_v14, %v3159_v30  ;;  %v2940_v30 = vpop.eup %2939  ;;  %v1218_v48 = vpop.trf.xlu1 }
 0x5a3   : > { %v1830_v0 = vmul.f32 %v2940_v30, %v2940_v30  ;;  %v2942_v19 = vpop.eup %2941 }
 0x5a4   : > { %v974_v50 = vpop.f32.mrb[8].mxu0  ;;  %2264 = vperm.xlu1 %2882, %v2256_v13   ;;  %v2042_v59 = vmul.f32 %v2942_v19, %v2942_v19 }
 0x5a5   : > { %v2701_v45 = vpop.f32.mrb[9].mxu0  ;;  %v1832_v61 = vmul.f32 %v2950_v22, %v1830_v0 }
 0x5a6   : > { %v977_v12 = vpop.f32.mrb[10].mxu0  ;;  %v2044_v35 = vmul.f32 %v2950_v22, %v2042_v59  ;;  %v1219_v23 = vpop.trf.xlu1 }
 0x5a7   : > { %v2702_v26 = vpop.f32.mrb[11].mxu0 }
 0x5ac   : > { %v1186_v41 = vpop.f32.mrb[12].mxu0 }
 0x5ad   : > { %v2715_v62 = vpop.f32.mrb[13].mxu0 }
 0x5ae   : > { %v1189_v24 = vpop.f32.mrb[14].mxu0 }
 0x5af   : > { %v2716_v27 = vpop.f32.mrb[15].mxu0 }
 0x5b4   : > { %v3484_v34 = vpop.f32.mrb[16].mxu0 }
 0x5b5   : > { %v2729_v58 = vpop.f32.mrb[17].mxu0 }
 0x5b6   : > { %v1401_v57 = vpop.f32.mrb[18].mxu0 }
 0x5b7   : > { %v2730_v15 = vpop.f32.mrb[19].mxu0 }
 0x5bc   : > { %1422 = vxpose.xlu0.c.b16.start.end [1/1] (short) (narrow) %v3414_v37, 32 }
 0x5c3   : > { %v1770_v25 = vpop.xlane.xlu0 %1769 }
 0x5c4   : > { %2943 = vrcp.f32 %v1770_v25 }
 0x5c6   : > { %v794_v2 = vpop.permute.xlu1 %793 }
 0x5c7   : > { %v1982_v11 = vpop.xlane.xlu0 %1981  ;;  %v797_v38 = vmul.f32 %v794_v2, %v3481_v55  ;;  %v873_v2 = vld [vmem:[#allocation4 + $0x10] sm:$0xff] }
 0x5c8   : > { %2945 = vrcp.f32 %v1982_v11 }
 0x5c9   : > { %1840 = vperm.xlu0 %2883, %v1832_v61  }
 0x5cb   : > { %v2194_v33 = vpop.xlane.xlu0 %2193 }
 0x5cc   : > { %2947 = vrcp.f32 %v2194_v33 }
 0x5cd   : > { %2052 = vperm.xlu0 %2883, %v2044_v35  }
 0x5ce   : > { %v2944_v36 = vpop.eup %2943 }
 0x5cf   : > { %v1829_v63 = vmul.f32 %v2944_v36, %v2944_v36 }
 0x5d1   : > { %v1831_v39 = vmul.f32 %v2949_v10, %v1829_v63  ;;  %v1006_v6 = vpop.trf.xlu0 }
 0x5d2   : > { %v2946_v56 = vpop.eup %2945 }
 0x5d3   : > { %v2041_v37 = vmul.f32 %v2946_v56, %v2946_v56  ;;  %1835 = vperm.xlu1 %2882, %v1831_v39  }
 0x5d5   : > { %v3488_v3 = vpop.f32.mrb[20].mxu0  ;;  %v2043_v40 = vmul.f32 %v2949_v10, %v2041_v37  ;;  %v1007_v16 = vpop.trf.xlu0 }
 0x5d6   : > { %v2948_v42 = vpop.eup %2947  ;;  %v2743_v43 = vpop.f32.mrb[21].mxu0 }
 0x5d7   : > { %v2253_v44 = vmul.f32 %v2948_v42, %v2948_v42  ;;  %v1613_v4 = vpop.f32.mrb[22].mxu0  ;;  %2047 = vperm.xlu0 %2883, %v2043_v40  }
 0x5d8   : > { %v2744_v46 = vpop.f32.mrb[23].mxu0 }
 0x5d9   : > { %v2255_v28 = vmul.f32 %v2949_v10, %v2253_v44 }
 0x5db   : > { %2259 = vperm.xlu1 %2882, %v2255_v28  }
 0x5f5   : > { %1846 = vxpose.xlu0.c.b16.start.end [1/1] (short) (narrow) %v3443_v9, 32  ;;  %v993_v49 = vpop.permute.xlu1 %992 }
 0x5f6   : > { %v996_v52 = vmul.f32 %v993_v49, %v977_v12  ;;  %v871_v49 = vld [vmem:[#allocation4] sm:$0xff] }
 0x5f9   : > { %v988_v51 = vpop.permute.xlu1 %987 }
 0x5fa   : > { %v995_v53 = vmul.f32 %v988_v51, %v974_v50  ;;  %2058 = vxpose.xlu0.c.b16.start.end [1/1] (short) (narrow) %v3453_v17, 32  ;;  %v874_v51 = vld [vmem:[#allocation4 + $0x18] sm:$0xff] }
 0x5fc   : > { %v997_v31 = vpack.c.bf16 %v996_v52, %v995_v53 }
 0x5fd   : > { %v1205_v32 = vpop.permute.xlu1 %1204 }
 0x5fe   : > { %1634 = vxpose.xlu1.c.b16.start.end [1/1] (short) (narrow) %v3429_v54, 32  ;;  %v1208_v7 = vmul.f32 %v1205_v32, %v1189_v24 }
 0x5ff   : > { %2270 = vxpose.xlu0.c.b16.start.end [1/1] (short) (narrow) %v3463_v60, 32 }
 0x601   : > { %v1629_v1 = vpop.permute.xlu0 %1628  ;;  %v1200_v5 = vpop.permute.xlu1 %1199 }
 0x602   : > { %v1207_v8 = vmul.f32 %v1200_v5, %v1186_v41 }
 0x604   : > { %v1209_v10 = vpack.c.bf16 %v1208_v7, %v1207_v8 }
 0x605   : > { %v789_v9 = vpop.permute.xlu0 %788  ;;  %v1417_v29 = vpop.permute.xlu1 %1416 }
 0x606   : > { %v796_v21 = vmul.f32 %v789_v9, %v3478_v18  ;;  %v1420_v14 = vmul.f32 %v1417_v29, %v1401_v57  ;;  %v1632_v57 = vmul.f32 %v1629_v1, %v1613_v4 }
 0x608   : > { %v798_v20 = vpack.c.bf16 %v797_v38, %v796_v21 }
 0x609   : > { %v1412_v17 = vpop.permute.xlu1 %1411 }
 0x60a   : > { %v1419_v13 = vmul.f32 %v1412_v17, %v3484_v34  ;;  %2689 = vmatprep.subr.bf16.mxu1 %v798_v20  ;;  %v1822_v54 = vpop.f32.mrb[24].mxu0 }
 0x60b   : > { %2690 = vmatpush3.bf16.msra.mxu1 %v798_v20  ;;  %v2757_v60 = vpop.f32.mrb[25].mxu0 }
 0x60c   : > { %v1421_v50 = vpack.c.bf16 %v1420_v14, %v1419_v13  ;;  %2703 = vmatprep.subr.bf16.mxu1 %v997_v31  ;;  %v1825_v45 = vpop.f32.mrb[26].mxu0 }
 0x60d   : > { %v2758_v12 = vpop.f32.mrb[27].mxu0 }
 0x60e   : > { %2692 = vmatmul.mubr.msk.bf16.vlgmr.msra.gmra.mrb[4].mxu1 %vm815_vm5, %v808_v47 }
 0x60f   : > { %2704 = vmatpush3.bf16.msra.mxu1 %v997_v31  ;;  %2705 = vmatprep.mubr.msk.bf16.mxu1 %vm815_vm5, %v1006_v6 }
 0x610   : > { %2717 = vmatprep.subr.bf16.mxu1 %v1209_v10 }
 0x612   : > { %v2034_v18 = vpop.f32.mrb[28].mxu0 }
 0x613   : > { %v2771_v55 = vpop.f32.mrb[29].mxu0 }
 0x614   : > { %v2037_v26 = vpop.f32.mrb[30].mxu0 }
 0x615   : > { %v2772_v41 = vpop.f32.mrb[31].mxu0 }
 0x616   : > { %2706 = vmatmul.mubr.msk.bf16.vlgmr.msra.gmra.mrb[8].mxu1 %vm815_vm5, %v1007_v16  ;;  %v872_v16 = vld [vmem:[#allocation4 + $0x8] sm:$0xff] }
 0x617   : > { %2718 = vmatpush3.bf16.msra.mxu1 %v1209_v10  ;;  %2719 = vmatprep.mubr.msk.bf16.mxu1 %vm815_vm5, %v1218_v48 }
 0x618   : > { %2731 = vmatprep.subr.bf16.mxu1 %v1421_v50 }
 0x61a   : > { %v2246_v62 = vpop.f32.mrb[32].mxu0 }
 0x61b   : > { %v2785_v24 = vpop.f32.mrb[33].mxu0 }
 0x61c   : > { %v2249_v27 = vpop.f32.mrb[34].mxu0 }
 0x61d   : > { %v2786_v34 = vpop.f32.mrb[35].mxu0  ;;  %v1624_v58 = vpop.permute.xlu0 %1623 }
 0x61e   : > { %v1631_v15 = vmul.f32 %v1624_v58, %v3488_v3  ;;  %2720 = vmatmul.mubr.msk.bf16.vlgmr.msra.gmra.mrb[12].mxu1 %vm815_vm5, %v1219_v23 }
 0x61f   : > { %2732 = vmatpush3.bf16.msra.mxu1 %v1421_v50 }
 0x620   : > { %v1633_v30 = vpack.c.bf16 %v1632_v57, %v1631_v15 }
 0x622   : > { %v1430_v0 = vpop.trf.xlu0  ;;  %2745 = vmatprep.subr.bf16.mxu1 %v1633_v30 }
 0x623   : > { %2733 = vmatprep.mubr.msk.bf16.mxu1 %vm815_vm5, %v1430_v0  ;;  %v2265_v59 = vpop.permute.xlu1 %2264 }
 0x624   : > { %v2268_v3 = vmul.f32 %v2265_v59, %v2249_v27 }
 0x626   : > { %v1431_v25 = vpop.trf.xlu0 }
 0x627   : > { %2734 = vmatmul.mubr.msk.bf16.vlgmr.msra.gmra.mrb[16].mxu1 %vm815_vm5, %v1431_v25 }
 0x628   : > { %2746 = vmatpush3.bf16.msra.mxu1 %v1633_v30 }
 0x648   : > { %v1841_v19 = vpop.permute.xlu0 %1840 }
 0x649   : > { %v1844_v61 = vmul.f32 %v1841_v19, %v1825_v45 }
 0x64c   : > { %v2053_v11 = vpop.permute.xlu0 %2052 }
 0x64d   : > { %v2056_v63 = vmul.f32 %v2053_v11, %v2037_v26 }
 0x652   : > { %v1836_v22 = vpop.permute.xlu1 %1835 }
 0x653   : > { %v1843_v33 = vmul.f32 %v1836_v22, %v1822_v54 }
 0x655   : > { %v1845_v35 = vpack.c.bf16 %v1844_v61, %v1843_v33 }
 0x656   : > { %v2048_v36 = vpop.permute.xlu0 %2047 }
 0x657   : > { %v2055_v39 = vmul.f32 %v2048_v36, %v2034_v18  ;;  %2759 = vmatprep.subr.bf16.mxu1 %v1845_v35 }
 0x659   : > { %v2057_v56 = vpack.c.bf16 %v2056_v63, %v2055_v39 }
 0x65a   : > { %v2260_v37 = vpop.permute.xlu1 %2259 }
 0x65b   : > { %v2267_v40 = vmul.f32 %v2260_v37, %v2246_v62  ;;  %v1854_v43 = vpop.trf.xlu0 }
 0x65d   : > { %v2269_v42 = vpack.c.bf16 %v2268_v3, %v2267_v40 }
 0x65f   : > { %v1855_v4 = vpop.trf.xlu0 }
 0x663   : > { %v2066_v28 = vpop.trf.xlu0 }
 0x664   : > { %v1642_v44 = vpop.trf.xlu1 }
 0x665   : > { %2747 = vmatprep.mubr.msk.bf16.mxu1 %vm815_vm5, %v1642_v44 }
 0x667   : > { %v2067_v47 = vpop.trf.xlu0 }
 0x668   : > { %v1643_v46 = vpop.trf.xlu1 }
 0x669   : > { %2748 = vmatmul.mubr.msk.bf16.vlgmr.msra.gmra.mrb[20].mxu1 %vm815_vm5, %v1643_v46 }
 0x66a   : > { %2760 = vmatpush3.bf16.msra.mxu1 %v1845_v35  ;;  %2761 = vmatprep.mubr.msk.bf16.mxu1 %vm815_vm5, %v1854_v43 }
 0x66b   : > { %2773 = vmatprep.subr.bf16.mxu1 %v2057_v56  ;;  %v2278_v48 = vpop.trf.xlu0 }
 0x66f   : > { %v2279_v23 = vpop.trf.xlu0 }
 0x671   : > { %2762 = vmatmul.mubr.msk.bf16.vlgmr.msra.gmra.mrb[24].mxu1 %vm815_vm5, %v1855_v4 }
 0x672   : > { %2774 = vmatpush3.bf16.msra.mxu1 %v2057_v56  ;;  %2775 = vmatprep.mubr.msk.bf16.mxu1 %vm815_vm5, %v2066_v28 }
 0x673   : > { %2787 = vmatprep.subr.bf16.mxu1 %v2269_v42 }
 0x679   : > { %2776 = vmatmul.mubr.msk.bf16.vlgmr.msra.gmra.mrb[28].mxu1 %vm815_vm5, %v2067_v47 }
 0x67a   : > { %2788 = vmatpush3.bf16.msra.mxu1 %v2269_v42  ;;  %2789 = vmatprep.mubr.msk.bf16.mxu1 %vm815_vm5, %v2278_v48 }
 0x681   : > { %2790 = vmatmul.mubr.msk.bf16.vlgmr.msra.gmra.mrb[32].mxu1 %vm815_vm5, %v2279_v23 }
 0x6e1   : > { %v2693_v6 = vpop.f32.mrb[4].mxu1 }
 0x6e2   : > { %v877_v52 = vadd.f32 %v2693_v6, %v873_v2  ;;  %v856_v53 = vpop.f32.mrb[5].mxu1 }
 0x6e3   : > { %v875_v31 = vadd.f32 %v871_v49, %v856_v53  ;;  %v2694_v32 = vpop.f32.mrb[6].mxu1 }
 0x6e4   : > { %882 = vst.msk [vmem:[#allocation4 + $0x10] sm:$0xff] %vm879_vm6, %v877_v52  ;;  %v878_v1 = vadd.f32 %v2694_v32, %v874_v51  ;;  %v859_v5 = vpop.f32.mrb[7].mxu1 }
 0x6e5   : > { %880 = vst.msk [vmem:[#allocation4] sm:$0xff] %vm879_vm6, %v875_v31  ;;  %v876_v7 = vadd.f32 %v872_v16, %v859_v5 }
 0x6e6   : > { %883 = vst.msk [vmem:[#allocation4 + $0x18] sm:$0xff] %vm879_vm6, %v878_v1 }
 0x6e7   : > { %881 = vst.msk [vmem:[#allocation4 + $0x8] sm:$0xff] %vm879_vm6, %v876_v7 }
 0x6e9   : > { %v2707_v8 = vpop.f32.mrb[8].mxu1 }
 0x6ea   : > { %1081 = vrot.lane.b32.xlu0 %v2707_v8, %s3019_s15  ;;  %v1054_v10 = vpop.f32.mrb[9].mxu1 }
 0x6eb   : > { %v2708_v9 = vpop.f32.mrb[10].mxu1  ;;  %v1071_v25 = vld [vmem:[#allocation4 + $0x10] sm:$0xff] }
 0x6ec   : > { %1083 = vrot.lane.b32.xlu1 %v2708_v9, %s3019_s15  ;;  %v1057_v29 = vpop.f32.mrb[11].mxu1  ;;  %v1069_v33 = vld [vmem:[#allocation4] sm:$0xff] }
 0x6ed   : > { %v1072_v11 = vld [vmem:[#allocation4 + $0x18] sm:$0xff] }
 0x6ee   : > { %1077 = vrot.lane.b32.xlu0 %v1054_v10, %s3019_s15  ;;  %v1070_v63 = vld [vmem:[#allocation4 + $0x8] sm:$0xff] }
 0x6f1   : > { %v2721_v38 = vpop.f32.mrb[12].mxu1 }
 0x6f2   : > { %1079 = vrot.lane.b32.xlu0 %v1057_v29, %s3019_s15  ;;  %1293 = vrot.lane.b32.xlu1 %v2721_v38, %s3020_s12  ;;  %v1266_v21 = vpop.f32.mrb[13].mxu1 }
 0x6f3   : > { %v2722_v20 = vpop.f32.mrb[14].mxu1 }
 0x6f4   : > { %v1269_v17 = vpop.f32.mrb[15].mxu1 }
 0x6f6   : > { %1289 = vrot.lane.b32.xlu0 %v1266_v21, %s3020_s12 }
 0x6fa   : > { %1291 = vrot.lane.b32.xlu0 %v1269_v17, %s3020_s12  ;;  %v2735_v14 = vpop.f32.mrb[16].mxu1 }
 0x6fb   : > { %v1478_v13 = vpop.f32.mrb[17].mxu1 }
 0x6fc   : > { %1501 = vrot.lane.b32.xlu1 %v1478_v13, %s3021_s16  ;;  %v2736_v54 = vpop.f32.mrb[18].mxu1 }
 0x6fd   : > { %v1481_v60 = vpop.f32.mrb[19].mxu1 }
 0x6fe   : > { %1295 = vrot.lane.b32.xlu0 %v2722_v20, %s3020_s12 }
 0x700   : > { %1505 = vrot.lane.b32.xlu1 %v2735_v14, %s3021_s16 }
 0x702   : > { %1503 = vrot.lane.b32.xlu0 %v1481_v60, %s3021_s16 }
 0x706   : > { %1507 = vrot.lane.b32.xlu0 %v2736_v54, %s3021_s16 }
 0x73c   : > { %v2749_v50 = vpop.f32.mrb[20].mxu1 }
 0x73d   : > { %v1690_v45 = vpop.f32.mrb[21].mxu1 }
 0x73e   : > { %1713 = vrot.lane.b32.xlu1 %v1690_v45, %s3022_s17  ;;  %v2750_v12 = vpop.f32.mrb[22].mxu1 }
 0x73f   : > { %v1693_v18 = vpop.f32.mrb[23].mxu1 }
 0x740   : > { %1715 = vrot.lane.b32.xlu0 %v1693_v18, %s3022_s17 }
 0x742   : > { %1717 = vrot.lane.b32.xlu1 %v2749_v50, %s3022_s17 }
 0x744   : > { %1719 = vrot.lane.b32.xlu0 %v2750_v12, %s3022_s17  ;;  %v2763_v55 = vpop.f32.mrb[24].mxu1 }
 0x745   : > { %v1902_v26 = vpop.f32.mrb[25].mxu1 }
 0x746   : > { %1925 = vrot.lane.b32.xlu1 %v1902_v26, %s3023_s18  ;;  %v2764_v41 = vpop.f32.mrb[26].mxu1 }
 0x747   : > { %v1905_v62 = vpop.f32.mrb[27].mxu1 }
 0x748   : > { %1927 = vrot.lane.b32.xlu0 %v1905_v62, %s3023_s18 }
 0x74a   : > { %1929 = vrot.lane.b32.xlu1 %v2763_v55, %s3023_s18 }
 0x74c   : > { %1931 = vrot.lane.b32.xlu0 %v2764_v41, %s3023_s18  ;;  %v2777_v24 = vpop.f32.mrb[28].mxu1 }
 0x74d   : > { %v2114_v27 = vpop.f32.mrb[29].mxu1 }
 0x74e   : > { %2137 = vrot.lane.b32.xlu1 %v2114_v27, %s3024_s19  ;;  %v2778_v34 = vpop.f32.mrb[30].mxu1 }
 0x74f   : > { %v2117_v58 = vpop.f32.mrb[31].mxu1 }
 0x750   : > { %2139 = vrot.lane.b32.xlu0 %v2117_v58, %s3024_s19 }
 0x752   : > { %2141 = vrot.lane.b32.xlu1 %v2777_v24, %s3024_s19 }
 0x754   : > { %2143 = vrot.lane.b32.xlu0 %v2778_v34, %s3024_s19  ;;  %v2791_v57 = vpop.f32.mrb[32].mxu1 }
 0x755   : > { %v2326_v15 = vpop.f32.mrb[33].mxu1 }
 0x756   : > { %v2792_v30 = vpop.f32.mrb[34].mxu1  ;;  %2349 = vrot.lane.b32.xlu1 %v2326_v15, %s3025_s20 }
 0x757   : > { %v2329_v0 = vpop.f32.mrb[35].mxu1 }
 0x758   : > { %2351 = vrot.lane.b32.xlu0 %v2329_v0, %s3025_s20 }
 0x75a   : > { %2353 = vrot.lane.b32.xlu1 %v2791_v57, %s3025_s20 }
 0x75c   : > { %v1082_v19 = vpop.permute.xlu0 %1081  ;;  %2355 = vrot.lane.b32.xlu0 %v2792_v30, %s3025_s20 }
 0x75d   : > { %v1091_v59 = vadd.f32 %v1082_v19, %v1071_v25 }
 0x75e   : > { %v1084_v22 = vpop.permute.xlu1 %1083 }
 0x75f   : > { %1096 = vst.msk [vmem:[#allocation4 + $0x10] sm:$0xff] %vm1093_vm9, %v1091_v59  ;;  %v1092_v61 = vadd.f32 %v1084_v22, %v1072_v11 }
 0x760   : > { %v1078_v35 = vpop.permute.xlu0 %1077 }
 0x761   : > { %1097 = vst.msk [vmem:[#allocation4 + $0x18] sm:$0xff] %vm1093_vm9, %v1092_v61  ;;  %v1089_v36 = vadd.f32 %v1078_v35, %v1069_v33 }
 0x763   : > { %1094 = vst.msk [vmem:[#allocation4] sm:$0xff] %vm1093_vm9, %v1089_v36 }
 0x764   : > { %v1080_v39 = vpop.permute.xlu0 %1079  ;;  %v1294_v56 = vpop.permute.xlu1 %1293 }
 0x765   : > { %v1090_v37 = vadd.f32 %v1080_v39, %v1070_v63 }
 0x766   : > { %v1283_v3 = vld [vmem:[#allocation4 + $0x10] sm:$0xff] }
 0x767   : > { %1095 = vst.msk [vmem:[#allocation4 + $0x8] sm:$0xff] %vm1093_vm9, %v1090_v37  ;;  %v1303_v40 = vadd.f32 %v1294_v56, %v1283_v3 }
 0x768   : > { %v1290_v42 = vpop.permute.xlu0 %1289  ;;  %v1284_v23 = vld [vmem:[#allocation4 + $0x18] sm:$0xff] }
 0x769   : > { %1308 = vst.msk [vmem:[#allocation4 + $0x10] sm:$0xff] %vm1305_vm0, %v1303_v40 }
 0x76a   : > { %v1281_v43 = vld [vmem:[#allocation4] sm:$0xff] }
 0x76b   : > { %v1301_v44 = vadd.f32 %v1290_v42, %v1281_v43 }
 0x76c   : > { %v1292_v4 = vpop.permute.xlu0 %1291 }
 0x76d   : > { %1306 = vst.msk [vmem:[#allocation4] sm:$0xff] %vm1305_vm0, %v1301_v44 }
 0x76e   : > { %v1282_v46 = vld [vmem:[#allocation4 + $0x8] sm:$0xff]  ;;  %v1502_v28 = vpop.permute.xlu1 %1501 }
 0x76f   : > { %v1302_v47 = vadd.f32 %v1292_v4, %v1282_v46 }
 0x770   : > { %v1296_v48 = vpop.permute.xlu0 %1295  ;;  %v1495_v49 = vld [vmem:[#allocation4 + $0x10] sm:$0xff] }
 0x771   : > { %1307 = vst.msk [vmem:[#allocation4 + $0x8] sm:$0xff] %vm1305_vm0, %v1302_v47  ;;  %v1304_v2 = vadd.f32 %v1296_v48, %v1284_v23  ;;  %v2374_v47 = vld [vmem:[%s3586_s2] sm:$0xff] (!%p2551_p5)  ;;  %v3026_v48 = vmov (!%p2551_p5), 0   ;;  %v2377_v23 = vld [vmem:[%s3586_s2 + $0x18] sm:$0xff] (!%p2551_p5) }
 0x772   : > { %v1506_v6 = vpop.permute.xlu1 %1505  ;;  %2952 = vset.pattern.permute.xlu1 (!%p2551_p5), %v3026_v48  ;;  %2951 = vset.pattern.permute.xlu0 (!%p2551_p5), %v3026_v48 }
 0x773   : > { %1309 = vst.msk [vmem:[#allocation4 + $0x18] sm:$0xff] %vm1305_vm0, %v1304_v2  ;;  %v1515_v51 = vadd.f32 %v1506_v6, %v1495_v49  ;;  %2384 = vperm.xlu0 (!%p2551_p5), %2951, %v2374_v47   ;;  %v2375_v2 = vld [vmem:[%s3586_s2 + $0x8] sm:$0xff] (!%p2551_p5) }
 0x774   : > { %v1493_v52 = vld [vmem:[#allocation4] sm:$0xff]  ;;  %v1504_v53 = vpop.permute.xlu0 %1503 }
 0x775   : > { %v1513_v16 = vadd.f32 %v1502_v28, %v1493_v52  ;;  %1520 = vst.msk [vmem:[#allocation4 + $0x10] sm:$0xff] %vm1517_vm1, %v1515_v51  ;;  %v2376_v28 = vld [vmem:[%s3586_s2 + $0x10] sm:$0xff] (!%p2551_p5)  ;;  %v2552_v51 = vld [vmem:[%s3591_s7] ss:$0 sm:$0xff] (!%p2551_p5) }
 0x776   : > { %2394 = vperm.xlu1 (!%p2551_p5), %2952, %v2376_v28  }
 0x777   : > { %1518 = vst.msk [vmem:[#allocation4] sm:$0xff] %vm1517_vm1, %v1513_v16  ;;  %2389 = vperm.xlu0 (!%p2551_p5), %2951, %v2375_v2  }
 0x778   : > { %v1494_v31 = vld [vmem:[#allocation4 + $0x8] sm:$0xff]  ;;  %v1508_v32 = vpop.permute.xlu0 %1507 }
 0x779   : > { %v1514_v1 = vadd.f32 %v1504_v53, %v1494_v31 }
 0x77a   : > { %v1496_v5 = vld [vmem:[#allocation4 + $0x18] sm:$0xff]  ;;  %2399 = vperm.xlu1 (!%p2551_p5), %2952, %v2377_v23  }
 0x77b   : > { %1519 = vst.msk [vmem:[#allocation4 + $0x8] sm:$0xff] %vm1517_vm1, %v1514_v1  ;;  %v1516_v7 = vadd.f32 %v1508_v32, %v1496_v5 }
 0x77c   : > { %v1707_v20 = vld [vmem:[#allocation4 + $0x10] sm:$0xff] }
 0x77d   : > { %1521 = vst.msk [vmem:[#allocation4 + $0x18] sm:$0xff] %vm1517_vm1, %v1516_v7 }
 0x77e   : > { %v1705_v8 = vld [vmem:[#allocation4] sm:$0xff] }
 0x782   : > { %v1706_v29 = vld [vmem:[#allocation4 + $0x8] sm:$0xff] }
 0x784   : > { %v1708_v54 = vld [vmem:[#allocation4 + $0x18] sm:$0xff] }
 0x7b0   : > { %v1714_v10 = vpop.permute.xlu1 %1713 }
 0x7b1   : > { %v1725_v9 = vadd.f32 %v1714_v10, %v1705_v8 }
 0x7b2   : > { %v1716_v38 = vpop.permute.xlu0 %1715 }
 0x7b3   : > { %1730 = vst.msk [vmem:[#allocation4] sm:$0xff] %vm1729_vm2, %v1725_v9  ;;  %v1726_v21 = vadd.f32 %v1716_v38, %v1706_v29 }
 0x7b4   : > { %v1718_v17 = vpop.permute.xlu1 %1717 }
 0x7b5   : > { %1731 = vst.msk [vmem:[#allocation4 + $0x8] sm:$0xff] %vm1729_vm2, %v1726_v21  ;;  %v1727_v14 = vadd.f32 %v1718_v17, %v1707_v20 }
 0x7b6   : > { %v1720_v13 = vpop.permute.xlu0 %1719 }
 0x7b7   : > { %1732 = vst.msk [vmem:[#allocation4 + $0x10] sm:$0xff] %vm1729_vm2, %v1727_v14  ;;  %v1728_v60 = vadd.f32 %v1720_v13, %v1708_v54 }
 0x7b8   : > { %v1926_v50 = vpop.permute.xlu1 %1925 }
 0x7b9   : > { %1733 = vst.msk [vmem:[#allocation4 + $0x18] sm:$0xff] %vm1729_vm2, %v1728_v60 }
 0x7ba   : > { %v1917_v45 = vld [vmem:[#allocation4] sm:$0xff]  ;;  %v1928_v12 = vpop.permute.xlu0 %1927 }
 0x7bb   : > { %v1937_v18 = vadd.f32 %v1926_v50, %v1917_v45 }
 0x7bc   : > { %v1918_v55 = vld [vmem:[#allocation4 + $0x8] sm:$0xff]  ;;  %v1930_v26 = vpop.permute.xlu1 %1929 }
 0x7bd   : > { %1942 = vst.msk [vmem:[#allocation4] sm:$0xff] %vm1941_vm3, %v1937_v18  ;;  %v1938_v41 = vadd.f32 %v1928_v12, %v1918_v55 }
 0x7be   : > { %v1919_v62 = vld [vmem:[#allocation4 + $0x10] sm:$0xff]  ;;  %v1932_v24 = vpop.permute.xlu0 %1931 }
 0x7bf   : > { %1943 = vst.msk [vmem:[#allocation4 + $0x8] sm:$0xff] %vm1941_vm3, %v1938_v41  ;;  %v1939_v27 = vadd.f32 %v1930_v26, %v1919_v62 }
 0x7c0   : > { %v1920_v34 = vld [vmem:[#allocation4 + $0x18] sm:$0xff]  ;;  %v2138_v58 = vpop.permute.xlu1 %2137 }
 0x7c1   : > { %1944 = vst.msk [vmem:[#allocation4 + $0x10] sm:$0xff] %vm1941_vm3, %v1939_v27  ;;  %v1940_v57 = vadd.f32 %v1932_v24, %v1920_v34 }
 0x7c2   : > { %v2140_v15 = vpop.permute.xlu0 %2139 }
 0x7c3   : > { %1945 = vst.msk [vmem:[#allocation4 + $0x18] sm:$0xff] %vm1941_vm3, %v1940_v57 }
 0x7c4   : > { %v2129_v30 = vld [vmem:[#allocation4] sm:$0xff]  ;;  %v2142_v19 = vpop.permute.xlu1 %2141 }
 0x7c5   : > { %v2149_v0 = vadd.f32 %v2138_v58, %v2129_v30 }
 0x7c6   : > { %v2130_v25 = vld [vmem:[#allocation4 + $0x8] sm:$0xff]  ;;  %v2144_v22 = vpop.permute.xlu0 %2143 }
 0x7c7   : > { %2154 = vst.msk [vmem:[#allocation4] sm:$0xff] %vm2153_vm4, %v2149_v0  ;;  %v2150_v59 = vadd.f32 %v2140_v15, %v2130_v25 }
 0x7c8   : > { %v2131_v11 = vld [vmem:[#allocation4 + $0x10] sm:$0xff]  ;;  %v2350_v36 = vpop.permute.xlu1 %2349 }
 0x7c9   : > { %2155 = vst.msk [vmem:[#allocation4 + $0x8] sm:$0xff] %vm2153_vm4, %v2150_v59  ;;  %v2151_v61 = vadd.f32 %v2142_v19, %v2131_v11 }
 0x7ca   : > { %v2132_v33 = vld [vmem:[#allocation4 + $0x18] sm:$0xff]  ;;  %v2352_v39 = vpop.permute.xlu0 %2351 }
 0x7cb   : > { %2156 = vst.msk [vmem:[#allocation4 + $0x10] sm:$0xff] %vm2153_vm4, %v2151_v61  ;;  %v2152_v35 = vadd.f32 %v2144_v22, %v2132_v33 }
 0x7cc   : > { %v2354_v42 = vpop.permute.xlu1 %2353 }
 0x7cd   : > { %2157 = vst.msk [vmem:[#allocation4 + $0x18] sm:$0xff] %vm2153_vm4, %v2152_v35 }
 0x7ce   : > { %v2341_v63 = vld [vmem:[#allocation4] sm:$0xff]  ;;  %v2356_v44 = vpop.permute.xlu0 %2355 }
 0x7cf   : > { %v2361_v56 = vadd.f32 %v2350_v36, %v2341_v63 }
 0x7d0   : > { %v2342_v37 = vld [vmem:[#allocation4 + $0x8] sm:$0xff] }
 0x7d1   : > { %2366 = vst.msk [vmem:[#allocation4] sm:$0xff] %vm2365_vm8, %v2361_v56  ;;  %v2362_v3 = vadd.f32 %v2352_v39, %v2342_v37  ;;  %2373 = sbr.rel (%p2551_p5) target bundleno = 2066 (0x812), region = 60 }
 0x7d2   : > { %v2343_v40 = vld [vmem:[#allocation4 + $0x10] sm:$0xff] }
 0x7d3   : > { %2367 = vst.msk [vmem:[#allocation4 + $0x8] sm:$0xff] %vm2365_vm8, %v2362_v3  ;;  %v2363_v43 = vadd.f32 %v2354_v42, %v2343_v40 }
 0x7d4   : > { %v2344_v4 = vld [vmem:[#allocation4 + $0x18] sm:$0xff] }
 0x7d5   : > { %2368 = vst.msk [vmem:[#allocation4 + $0x10] sm:$0xff] %vm2365_vm8, %v2363_v43  ;;  %v2364_v46 = vadd.f32 %v2356_v44, %v2344_v4 }
 0x7d7   : > { %2369 = vst.msk [vmem:[#allocation4 + $0x18] sm:$0xff] %vm2365_vm8, %v2364_v46 }
 0x7d8   : > { %v2378_v6 = vld [vmem:[#allocation4] sm:$0xff] }
 0x7da   : > { %v2379_v7 = vld [vmem:[#allocation4 + $0x8] sm:$0xff] }
 0x7dc   : > { %v2380_v49 = vld [vmem:[#allocation4 + $0x10] sm:$0xff] }
 0x7de   : > { %v2381_v5 = vld [vmem:[#allocation4 + $0x18] sm:$0xff] }
 0x7f2   : > { %v2385_v53 = vpop.permute.xlu0 %2384 }
 0x7f3   : > { %v2402_v31 = vmul.f32 %v2385_v53, %v2378_v6 }
 0x7f5   : > { %v2395_v52 = vpop.permute.xlu1 %2394  ;;  %v2413_v1 = vadd.f32 %v2552_v51, %v2402_v31 }
 0x7f6   : > { %v2404_v16 = vmul.f32 %v2395_v52, %v2380_v49  ;;  %v2390_v10 = vpop.permute.xlu0 %2389 }
 0x7f7   : > { %v2421_v29 = vmin.f32 %v2413_v1, 0.0  ;;  %v2403_v21 = vmul.f32 %v2390_v10, %v2379_v7  ;;  %vm2417_vm11 = vcmp.gt.f32.partialorder %v2413_v1, 0.0 }
 0x7f8   : > { %v2415_v32 = vadd.f32 %v2552_v51, %v2404_v16 }
 0x7f9   : > { %v2400_v8 = vpop.permute.xlu1 %2399  ;;  %v2425_v17 = vmul.f32 1.442695, %v2421_v29  ;;  %v2414_v13 = vadd.f32 %v2552_v51, %v2403_v21 }
 0x7fa   : > { %v2423_v9 = vmin.f32 %v2415_v32, 0.0  ;;  %v2405_v38 = vmul.f32 %v2400_v8, %v2381_v5  ;;  %vm2419_vm10 = vcmp.gt.f32.partialorder %v2415_v32, 0.0 }
 0x7fb   : > { %v2422_v60 = vmin.f32 %v2414_v13, 0.0  ;;  %vm2418_vm13 = vcmp.gt.f32.partialorder %v2414_v13, 0.0 }
 0x7fc   : > { %v2429_v20 = vmul.f32 1.442695, %v2423_v9  ;;  %v2416_v14 = vadd.f32 %v2552_v51, %v2405_v38 }
 0x7fd   : > { %v2427_v45 = vmul.f32 1.442695, %v2422_v60 }
 0x7fe   : > { %2953 = vpow2.f32 %v2429_v20  ;;  %v2424_v54 = vmin.f32 %v2416_v14, 0.0  ;;  %vm2420_vm12 = vcmp.gt.f32.partialorder %v2416_v14, 0.0 }
 0x7ff   : > { %2955 = vpow2.f32 %v2425_v17 }
 0x800   : > { %v2431_v50 = vmul.f32 1.442695, %v2424_v54 }
 0x802   : > { %2957 = vpow2.f32 %v2431_v50 }
 0x803   : > { %2959 = vpow2.f32 %v2427_v45 }
 0x808   : > { %v2954_v12 = vpop.eup %2953 }
 0x809   : > { %v2956_v18 = vpop.eup %2955  ;;  %v2555_v55 = vadd.f32 -1.0, %v2954_v12 }
 0x80a   : > { %v2553_v26 = vadd.f32 -1.0, %v2956_v18 }
 0x80b   : > { %v2439_v41 = vsel %vm2419_vm10, %v2415_v32, %v2555_v55 }
 0x80c   : > { %2443 = vst.msk [vmem:[#allocation5 + $0x10] sm:$0xff] %vm603_vm7, %v2439_v41  ;;  %v2437_v62 = vsel %vm2417_vm11, %v2413_v1, %v2553_v26  ;;  %v2958_v24 = vpop.eup %2957 }
 0x80d   : > { %2441 = vst.msk [vmem:[#allocation5] sm:$0xff] %vm603_vm7, %v2437_v62  ;;  %v2960_v27 = vpop.eup %2959  ;;  %v2556_v34 = vadd.f32 -1.0, %v2958_v24 }
 0x80e   : > { %v2554_v58 = vadd.f32 -1.0, %v2960_v27 }
 0x80f   : > { %v2440_v57 = vsel %vm2420_vm12, %v2416_v14, %v2556_v34 }
 0x810   : > { %2444 = vst.msk [vmem:[#allocation5 + $0x18] sm:$0xff] %vm603_vm7, %v2440_v57  ;;  %v2438_v15 = vsel %vm2418_vm13, %v2414_v13, %v2554_v58 }
 0x811   : > { %2442 = vst.msk [vmem:[#allocation5 + $0x8] sm:$0xff] %vm603_vm7, %v2438_v15 }
 0x812 PF: > { %p2825_p6 = scmp.eq.s32.totalorder %s3080_s28, 1  ;;  %s3027_s11 = smov [#allocation5]  }
 0x813   : > { %s2451_s13 = sshll.u32 %s3027_s11, 4  ;;  %s2452_s13 = int_to_ptr.vmem [resolvable:$true] %s2451_s13 }
 0x814   : > { %s2961_s14 = scalar_lea.vmem %s2452_s13, 512  ;;  %p2968_p10 = scmp.lt.s32.totalorder %s2452_s13, %s2452_s13 }
 0x815   : > { %p2962_p7 = scmp.ne.s32.totalorder %s2452_s13, %s2961_s14  ;;  %p2969_p11 = scmp.lt.s32.totalorder %s2961_s14, %s2961_s14 }
 0x817   : > { %p2963_p8 = pnand %p2962_p7, %p2825_p6  ;;  %p2970_p12 = por %p2969_p11, %p2968_p10 }
 0x819   : > { %p2964_p9 = pneg %p2963_p8 }
 0x81b   : > { %p2971_p13 = pnand %p2970_p12, %p2964_p9 }
 0x81d   : > { %2974 = shalt.err (!%p2971_p13)
}
 0x81e   : > { %s2975_s17 = scalar_lea.hbm %s3592_s8, 512 }
 0x81f   : > { %p2976_p0 = scmp.ne.s32.totalorder %s3592_s8, %s2975_s17  ;;  %p2981_p3 = scmp.lt.u32.totalorder %s2975_s17, %s3592_s8 }
 0x821   : > { %p2977_p1 = pnand %p2976_p0, %p2825_p6 }
 0x823   : > { %p2978_p2 = pneg %p2977_p1 }
 0x825   : > { %p2983_p4 = pnand %p2981_p3, %p2978_p2 }
 0x827   : > { %2986 = shalt.err (!%p2983_p4)
}
 0x828   : > { %s3028_s22 = smov 128  }
 0x829   : > { %2822 = dma.vmem_to_hbm [thread:$0]  (%p2825_p6), %s2452_s13, 512, %s3592_s8, [#allocation6], %s3028_s22, %s3028_s22, %s3019_s15  }
 0x82a   : > { %2992 = dma.done.wait (%p2825_p6), [#allocation6], 512  }
 0x82b   : > { %2994 = vsyncadd (%p2825_p6), [#allocation6], 4294966784 }
 0x82c PF: > { %s19_s27 = sadd.s32 1, %s2997_s27  }
 0x82d   : > { %p16_p5 = scmp.ge.s32.totalorder %s19_s27, 4  }
 0x82f   :  { %18 = sbr.rel (!%p16_p5) target bundleno = 1 (0x1), region = 90 }
 0x836   :  { %2467 = vsyncpa [#allocation6], 1 }
 0x837   :  { %2469 = vsyncpa [#allocation6 + $0x1], 1 }

</bundles_post_ra>
